<compile_context>
chip_gen: v5e
topology: v5e:2x2
jax: 0.10.0
libtpu: 0.0.40
codegen_flags: <defaults>
</compile_context>

<pallas_src>
import functools

import jax
import jax.numpy as jnp
import numpy as np
from jax.experimental import pallas as pl
from jax.experimental.pallas import tpu as pltpu

EPS = 1e-5                     # PyTorch BatchNorm2d default eps
NUM_CLASSES = 16
PCA_COMPONENTS = 30
PATCH_SIZE = 13
C1 = 8                         # conv1 output channels
C2 = 16                        # conv2 output channels
MARGIN = 128                   # zero margin (lanes) around the padded pooled scratch
SLAB_W = 4 + 2 * C2 + 9 * C1   # packed parameter slab width = 108


def _round_up(x, m):
    return ((x + m - 1) // m) * m


# --------------------------------------------------------------------------- #
# Fused Pallas kernel (one grid step == one whole-image group / "tile")
# --------------------------------------------------------------------------- #
def _make_kernel(Hp, Wp, npa, out_tile):
    S = Wp + 1                 # padded row stride of the pooled layout
    M = (Hp + 1) * S           # lanes per image in the padded pooled layout
    inv_nsp = 1.0 / float(Hp * Wp)

    def kernel(p1_ref, w1_ref, mask_ref, slab_ref, o_ref, apad_scr):
        # ---- unpack the packed parameter slab (one tiny shared operand) ------
        slab = slab_ref[...]                       # (16, 108) f32
        t1 = slab[0:C1, 0:1]                       # BN1 shift (scale folded into w1)
        t2 = slab[:, 1:2]                          # BN2 shift (scale folded into w2)
        fc1b = slab[:, 2:3]
        fc2b = slab[:, 3:4]
        fc1w = slab[:, 4:4 + C2]                   # (16, 16)
        fc2w = slab[:, 4 + C2:4 + 2 * C2]          # (16, 16)
        w2m = slab[:, 4 + 2 * C2:SLAB_W]           # (16, 72) scale-folded conv2 weights
        mask = mask_ref[...]                       # (1, npa): 1 on real-pixel lanes

        # Keep only the shift margins of the scratch zeroed (cheap: 2*MARGIN
        # lanes, megacore-safe); the interior is fully overwritten below.
        zpad = jnp.zeros((C1, MARGIN), jnp.float32)
        apad_scr[:, pl.ds(0, MARGIN)] = zpad
        apad_scr[:, pl.ds(MARGIN + npa, MARGIN)] = zpad

        # ---- stage 1: conv1 (+folded BN1 scale) over the four 2x2-pool phases,
        #      one bf16 matmul; 4-way max taken directly on the matmul value ---
        y1 = jnp.dot(w1_ref[...], p1_ref[...],
                     preferred_element_type=jnp.float32)          # (C1, 4*npa)
        mx = jnp.maximum(
            jnp.maximum(y1[:, 0 * npa:1 * npa], y1[:, 1 * npa:2 * npa]),
            jnp.maximum(y1[:, 2 * npa:3 * npa], y1[:, 3 * npa:4 * npa]))
        # BN shift + ReLU commute with the max; zero the padded-layout lanes so
        # conv2's shifted reads see genuine zero padding at image borders.
        a = jnp.maximum(mx + t1, 0.0) * mask                      # (C1, npa)
        apad_scr[:, pl.ds(MARGIN, npa)] = a

        # ---- stage 2: conv2 via nine static-offset reads of the padded scratch
        p2 = jnp.concatenate(
            [apad_scr[:, pl.ds(MARGIN + (dh - 1) * S + (dw - 1), npa)]
             for dh in range(3) for dw in range(3)], axis=0)      # (9*C1, npa)
        y2 = jnp.dot(w2m, p2, preferred_element_type=jnp.float32)
        y2 = jnp.maximum(y2 + t2, 0.0) * mask                     # (C2, npa)

        # ---- per-tile global average pool: bounded block-diagonal matmul -----
        r = jax.lax.broadcasted_iota(jnp.int32, (npa, out_tile), 0)
        c = jax.lax.broadcasted_iota(jnp.int32, (npa, out_tile), 1)
        avg = jnp.where((r >= c * M) & (r < (c + 1) * M),
                        inv_nsp, 0.0).astype(jnp.float32)         # (npa, out_tile)
        feat = jnp.dot(y2, avg, preferred_element_type=jnp.float32)   # (C2, out_tile)

        # ---- classifier (Dropout(0.5) == identity in eval mode) --------------
        h = jnp.maximum(
            jnp.dot(fc1w, feat, preferred_element_type=jnp.float32) + fc1b, 0.0)
        o_ref[...] = (jnp.dot(fc2w, h, preferred_element_type=jnp.float32) + fc2b)

    return kernel


# --------------------------------------------------------------------------- #
# JAX glue: im2col, BN folding, parameter packing, pallas_call
# --------------------------------------------------------------------------- #
def _im2col_3x3_cfirst(x_cbhw):
    """3x3 'same' patches in (K, B, H, W) layout; row order (kh, kw, ci)."""
    H, W = x_cbhw.shape[2], x_cbhw.shape[3]
    xp = jnp.pad(x_cbhw, ((0, 0), (0, 0), (1, 1), (1, 1)))
    rows = [xp[:, :, dh:dh + H, dw:dw + W] for dh in range(3) for dw in range(3)]
    return jnp.concatenate(rows, axis=0)


def _conv_w_to_mat(w_oihw):
    """(Cout, Cin, 3, 3) -> (Cout, 9*Cin), column order (kh, kw, ci)."""
    cout, cin = w_oihw.shape[:2]
    return jnp.transpose(w_oihw, (0, 2, 3, 1)).reshape(cout, 9 * cin)


def _fold_bn(gamma, beta, mean, var, conv_bias):
    scale = gamma / jnp.sqrt(var + EPS)
    shift = beta + scale * (conv_bias - mean)
    return scale.astype(jnp.float32), shift.astype(jnp.float32)


@functools.partial(jax.jit, static_argnames=("b_tile",))
def lightweight_sanet_forward(x_nchw, params, b_tile=32):
    B, Cin, H, W = x_nchw.shape
    Hp, Wp = H // 2, W // 2
    K1 = 9 * Cin
    S = Wp + 1
    M = (Hp + 1) * S

    b_tile = max(1, min(int(b_tile), B))
    T = (B + b_tile - 1) // b_tile
    Bp = T * b_tile
    NPa = _round_up(b_tile * M, 128)       # lane-aligned columns per tile
    OUT_TILE = _round_up(b_tile, 128)      # lane-dense output tile width

    x = x_nchw.astype(jnp.float32)
    if Bp > B:
        x = jnp.pad(x, ((0, Bp - B), (0, 0), (0, 0), (0, 0)))

    # stage-1 im2col (wrapper side, bf16-cast), pool-phase grouped and laid out
    # directly in the per-image zero-padded pooled grid used by stage 2.
    xc = jnp.transpose(x, (1, 0, 2, 3))                           # (Cin, Bp, H, W)
    patches = _im2col_3x3_cfirst(xc)                              # (K1, Bp, H, W)
    blocks = []
    for dy in range(2):
        for dx in range(2):
            blk = patches[:, :, dy:2 * Hp:2, dx:2 * Wp:2]         # (K1, Bp, Hp, Wp)
            blk = jnp.pad(blk, ((0, 0), (0, 0), (1, 0), (1, 0)))  # padded pooled grid
            blk = blk.reshape(K1, T, b_tile * M)
            blk = jnp.pad(blk, ((0, 0), (0, 0), (0, NPa - b_tile * M)))
            blocks.append(blk)                                    # (K1, T, NPa)
    p1 = jnp.stack(blocks, axis=2).reshape(K1, T * 4 * NPa).astype(jnp.bfloat16)

    # fold BN scales into the conv weights; pack the small tensors into one slab
    s1, t1 = _fold_bn(params['bn1_g'], params['bn1_b'], params['bn1_m'],
                      params['bn1_v'], params['conv1_b'])
    s2, t2 = _fold_bn(params['bn2_g'], params['bn2_b'], params['bn2_m'],
                      params['bn2_v'], params['conv2_b'])
    w1m = (_conv_w_to_mat(params['conv1_w']) * s1[:, None]).astype(jnp.bfloat16)
    w2m = _conv_w_to_mat(params['conv2_w']) * s2[:, None]         # (C2, 72) f32

    slab = jnp.concatenate(
        [jnp.pad(t1[:, None], ((0, C2 - C1), (0, 0))),            # col 0: t1
         t2[:, None],                                             # col 1: t2
         params['fc1_b'][:, None],                                # col 2
         params['fc2_b'][:, None],                                # col 3
         params['fc1_w'],                                         # cols 4..19
         params['fc2_w'],                                         # cols 20..35
         w2m], axis=1).astype(jnp.float32)                        # cols 36..107

    # shared valid-pixel mask for ONE tile (identical for every tile)
    mk = np.zeros((b_tile, Hp + 1, Wp + 1), np.float32)
    mk[:, 1:, 1:] = 1.0
    mk = np.pad(mk.reshape(1, b_tile * M), ((0, 0), (0, NPa - b_tile * M)))
    mask = jnp.asarray(mk)                                        # (1, NPa)

    kernel = _make_kernel(Hp, Wp, NPa, OUT_TILE)
    out = pl.pallas_call(
        kernel,
        grid=(T,),
        out_shape=jax.ShapeDtypeStruct((NUM_CLASSES, T * OUT_TILE), jnp.float32),
        in_specs=[
            pl.BlockSpec((K1, 4 * NPa), lambda i: (0, i)),        # per-tile im2col (bf16)
            pl.BlockSpec((C1, K1), lambda i: (0, 0)),             # conv1 weights (shared)
            pl.BlockSpec((1, NPa), lambda i: (0, 0)),             # valid mask (shared)
            pl.BlockSpec((C2, SLAB_W), lambda i: (0, 0)),         # packed params (shared)
        ],
        out_specs=pl.BlockSpec((NUM_CLASSES, OUT_TILE), lambda i: (0, i)),
        scratch_shapes=[pltpu.VMEM((C1, NPa + 2 * MARGIN), jnp.float32)],
        compiler_params=pltpu.CompilerParams(
            dimension_semantics=("parallel",),   # tiles are fully independent
            vmem_limit_bytes=32 * 1024 * 1024),
    )(p1, w1m, mask, slab)

    out = out.reshape(NUM_CLASSES, T, OUT_TILE)[:, :, :b_tile]
    return out.reshape(NUM_CLASSES, Bp)[:, :B].T                  # (B, NUM_CLASSES)


# --------------------------------------------------------------------------- #
# Parameters and pure-JAX reference (for correctness checking)
# --------------------------------------------------------------------------- #
def init_params(key):
    ks = jax.random.split(key, 16)
    n = lambda k, s, sc=0.1: sc * jax.random.normal(k, s, jnp.float32)
    u = lambda k, s: jax.random.uniform(k, s, jnp.float32, 0.5, 1.5)
    return {
        'conv1_w': n(ks[0], (C1, PCA_COMPONENTS, 3, 3)),
        'conv1_b': n(ks[1], (C1,)),
        'bn1_g': u(ks[2], (C1,)), 'bn1_b': n(ks[3], (C1,)),
        'bn1_m': n(ks[4], (C1,)), 'bn1_v': u(ks[5], (C1,)),
        'conv2_w': n(ks[6], (C2, C1, 3, 3)),
        'conv2_b': n(ks[7], (C2,)),
        'bn2_g': u(ks[8], (C2,)), 'bn2_b': n(ks[9], (C2,)),
        'bn2_m': n(ks[10], (C2,)), 'bn2_v': u(ks[11], (C2,)),
        'fc1_w': n(ks[12], (16, C2)),            # PyTorch Linear layout (out, in)
        'fc1_b': n(ks[13], (16,)),
        'fc2_w': n(ks[14], (NUM_CLASSES, 16)),   # (out, in)
        'fc2_b': n(ks[15], (NUM_CLASSES,)),
    }


def reference_forward(x_nchw, params, quantize_conv1_operands=False):
    """Pure-JAX reference.  quantize_conv1_operands=True mirrors the kernel's
    bf16 conv1 MXU operands (with f32 accumulation) for a tight comparison."""
    x = jnp.transpose(x_nchw, (0, 2, 3, 1)).astype(jnp.float32)   # NHWC

    def conv(x, w):
        wk = jnp.transpose(w, (2, 3, 1, 0))                        # HWIO
        return jax.lax.conv_general_dilated(
            x, wk, (1, 1), 'SAME', dimension_numbers=('NHWC', 'HWIO', 'NHWC'))

    def bn(x, g, be, m, v):
        return (x - m) / jnp.sqrt(v + EPS) * g + be

    if quantize_conv1_operands:
        s1, t1 = _fold_bn(params['bn1_g'], params['bn1_b'], params['bn1_m'],
                          params['bn1_v'], params['conv1_b'])
        w1q = (params['conv1_w'] * s1[:, None, None, None]
               ).astype(jnp.bfloat16).astype(jnp.float32)
        xq = x.astype(jnp.bfloat16).astype(jnp.float32)
        y = jax.nn.relu(conv(xq, w1q) + t1)
    else:
        y = jax.nn.relu(bn(conv(x, params['conv1_w']) + params['conv1_b'],
                           params['bn1_g'], params['bn1_b'],
                           params['bn1_m'], params['bn1_v']))
    B, H, W, C = y.shape
    Hp, Wp = H // 2, W // 2
    y = y[:, :2 * Hp, :2 * Wp, :].reshape(B, Hp, 2, Wp, 2, C).max(axis=(2, 4))
    y = jax.nn.relu(bn(conv(y, params['conv2_w']) + params['conv2_b'],
                       params['bn2_g'], params['bn2_b'],
                       params['bn2_m'], params['bn2_v']))
    pooled = y.mean(axis=(1, 2))
    h = jax.nn.relu(pooled @ params['fc1_w'].T + params['fc1_b'])
    return h @ params['fc2_w'].T + params['fc2_b']


if __name__ == "__main__":
    key = jax.random.PRNGKey(0)
    kx, kp = jax.random.split(key)
    B = 2
    x = jax.random.normal(kx, (B, PCA_COMPONENTS, PATCH_SIZE, PATCH_SIZE),
                          dtype=jnp.float32)
    params = init_params(kp)

    # b_tile=1 -> a 2-step batch grid, exercising the tiled "parallel" path.
    out = jax.block_until_ready(lightweight_sanet_forward(x, params, b_tile=1))
    assert out.shape == (B, NUM_CLASSES)

    ref_matched = reference_forward(x, params, quantize_conv1_operands=True)
    ref_f32 = reference_forward(x, params)

    # Tight check against a conv1-operand-precision-matched reference.
    err_m = float(jnp.max(jnp.abs(out - ref_matched)))
    assert jnp.allclose(out, ref_matched, rtol=2e-2, atol=2e-2), ("matched", err_m)
    # Looser check against the pure-f32 PyTorch-semantics reference
    # (conv1 MXU operands are bf16 in the kernel).
    err_f = float(jnp.max(jnp.abs(out - ref_f32)))
    assert jnp.allclose(out, ref_f32, rtol=5e-2, atol=5e-2), ("f32", err_f)

    print("KERNEL_OK")
</pallas_src>

<mosaic_0001>
module attributes {stable_mosaic.version = 11 : i64} {
  func.func @kernel(%arg0: i32, %arg1: memref<270x512xbf16, #tpu.memory_space<vmem>>, %arg2: memref<8x270xbf16, #tpu.memory_space<vmem>>, %arg3: memref<1x128xf32, #tpu.memory_space<vmem>>, %arg4: memref<16x108xf32, #tpu.memory_space<vmem>>, %arg5: memref<16x128xf32, #tpu.memory_space<vmem>>, %arg6: memref<8x384xf32, #tpu.memory_space<vmem>>) attributes {dimension_semantics = [#tpu.dimension_semantics<parallel>], iteration_bounds = array<i64: 2>, scalar_prefetch = 0 : i64, scratch_operands = 1 : i64, tpu.core_type = #tpu.core_type<tc>, window_params = [{transform_indices = @transform_0, window_bounds = array<i64: 270, 512>}, {pipeline_mode = #tpu.pipeline_mode<synchronous>, transform_indices = @transform_1, window_bounds = array<i64: 8, 270>}, {pipeline_mode = #tpu.pipeline_mode<synchronous>, transform_indices = @transform_2, window_bounds = array<i64: 1, 128>}, {pipeline_mode = #tpu.pipeline_mode<synchronous>, transform_indices = @transform_3, window_bounds = array<i64: 16, 108>}, {transform_indices = @transform_4, window_bounds = array<i64: 16, 128>}]} {
    %c0 = arith.constant 0 : index
    %c0_0 = arith.constant 0 : index
    %0 = vector.load %arg4[%c0, %c0_0] : memref<16x108xf32, #tpu.memory_space<vmem>>, vector<16x108xf32>
    %1 = vector.extract_strided_slice %0 {offsets = [0, 0], sizes = [8, 1], strides = [1, 1]} : vector<16x108xf32> to vector<8x1xf32>
    %2 = vector.extract_strided_slice %0 {offsets = [0, 1], sizes = [16, 1], strides = [1, 1]} : vector<16x108xf32> to vector<16x1xf32>
    %3 = vector.extract_strided_slice %0 {offsets = [0, 2], sizes = [16, 1], strides = [1, 1]} : vector<16x108xf32> to vector<16x1xf32>
    %4 = vector.extract_strided_slice %0 {offsets = [0, 3], sizes = [16, 1], strides = [1, 1]} : vector<16x108xf32> to vector<16x1xf32>
    %5 = vector.extract_strided_slice %0 {offsets = [0, 4], sizes = [16, 16], strides = [1, 1]} : vector<16x108xf32> to vector<16x16xf32>
    %6 = vector.extract_strided_slice %0 {offsets = [0, 20], sizes = [16, 16], strides = [1, 1]} : vector<16x108xf32> to vector<16x16xf32>
    %7 = vector.extract_strided_slice %0 {offsets = [0, 36], sizes = [16, 72], strides = [1, 1]} : vector<16x108xf32> to vector<16x72xf32>
    %c0_1 = arith.constant 0 : index
    %c0_2 = arith.constant 0 : index
    %8 = vector.load %arg3[%c0_1, %c0_2] : memref<1x128xf32, #tpu.memory_space<vmem>>, vector<1x128xf32>
    %cst = arith.constant 0.000000e+00 : f32
    %9 = vector.broadcast %cst : f32 to vector<8x128xf32>
    %c0_3 = arith.constant 0 : index
    %c0_4 = arith.constant 0 : index
    %10 = vector.load %arg6[%c0_3, %c0_4] : memref<8x384xf32, #tpu.memory_space<vmem>>, vector<8x128xf32>
    tpu.vector_store %arg6[%c0_3, %c0_4], %9 {strides = array<i32>} : memref<8x384xf32, #tpu.memory_space<vmem>>, vector<8x128xf32>,
    %c0_5 = arith.constant 0 : index
    %c256 = arith.constant 256 : index
    %11 = vector.load %arg6[%c0_5, %c256] : memref<8x384xf32, #tpu.memory_space<vmem>>, vector<8x128xf32>
    tpu.vector_store %arg6[%c0_5, %c256], %9 {strides = array<i32>} : memref<8x384xf32, #tpu.memory_space<vmem>>, vector<8x128xf32>,
    %c0_6 = arith.constant 0 : index
    %c0_7 = arith.constant 0 : index
    %12 = vector.load %arg2[%c0_6, %c0_7] : memref<8x270xbf16, #tpu.memory_space<vmem>>, vector<8x270xbf16>
    %c0_8 = arith.constant 0 : index
    %c0_9 = arith.constant 0 : index
    %13 = vector.load %arg1[%c0_8, %c0_9] : memref<270x512xbf16, #tpu.memory_space<vmem>>, vector<270x512xbf16>
    %cst_10 = arith.constant dense<0.000000e+00> : vector<8x512xf32>
    %14 = tpu.matmul %12, %13, %cst_10 {dimension_numbers = #tpu.dot_dimension_numbers<[1], [0], [0], [1], [0, 0, 1, 1], [], []>} : vector<8x270xbf16>, vector<270x512xbf16>, vector<8x512xf32> -> vector<8x512xf32>
    %15 = vector.extract_strided_slice %14 {offsets = [0, 0], sizes = [8, 128], strides = [1, 1]} : vector<8x512xf32> to vector<8x128xf32>
    %16 = vector.extract_strided_slice %14 {offsets = [0, 128], sizes = [8, 128], strides = [1, 1]} : vector<8x512xf32> to vector<8x128xf32>
    %17 = arith.maximumf %15, %16 : vector<8x128xf32>
    %18 = vector.extract_strided_slice %14 {offsets = [0, 256], sizes = [8, 128], strides = [1, 1]} : vector<8x512xf32> to vector<8x128xf32>
    %19 = vector.extract_strided_slice %14 {offsets = [0, 384], sizes = [8, 128], strides = [1, 1]} : vector<8x512xf32> to vector<8x128xf32>
    %20 = arith.maximumf %18, %19 : vector<8x128xf32>
    %21 = arith.maximumf %17, %20 : vector<8x128xf32>
    %22 = vector.broadcast %1 : vector<8x1xf32> to vector<8x128xf32>
    %23 = arith.addf %21, %22 : vector<8x128xf32>
    %cst_11 = arith.constant 0.000000e+00 : f32
    %24 = vector.broadcast %cst_11 : f32 to vector<8x128xf32>
    %25 = arith.maximumf %23, %24 : vector<8x128xf32>
    %26 = vector.broadcast %8 : vector<1x128xf32> to vector<8x128xf32>
    %27 = arith.mulf %25, %26 : vector<8x128xf32>
    %c0_12 = arith.constant 0 : index
    %c128 = arith.constant 128 : index
    %28 = vector.load %arg6[%c0_12, %c128] : memref<8x384xf32, #tpu.memory_space<vmem>>, vector<8x128xf32>
    tpu.vector_store %arg6[%c0_12, %c128], %27 {strides = array<i32>} : memref<8x384xf32, #tpu.memory_space<vmem>>, vector<8x128xf32>,
    %c0_13 = arith.constant 0 : index
    %c120 = arith.constant 120 : index
    %29 = vector.load %arg6[%c0_13, %c120] : memref<8x384xf32, #tpu.memory_space<vmem>>, vector<8x128xf32>
    %c0_14 = arith.constant 0 : index
    %c121 = arith.constant 121 : index
    %30 = vector.load %arg6[%c0_14, %c121] : memref<8x384xf32, #tpu.memory_space<vmem>>, vector<8x128xf32>
    %c0_15 = arith.constant 0 : index
    %c122 = arith.constant 122 : index
    %31 = vector.load %arg6[%c0_15, %c122] : memref<8x384xf32, #tpu.memory_space<vmem>>, vector<8x128xf32>
    %c0_16 = arith.constant 0 : index
    %c127 = arith.constant 127 : index
    %32 = vector.load %arg6[%c0_16, %c127] : memref<8x384xf32, #tpu.memory_space<vmem>>, vector<8x128xf32>
    %c0_17 = arith.constant 0 : index
    %c128_18 = arith.constant 128 : index
    %33 = vector.load %arg6[%c0_17, %c128_18] : memref<8x384xf32, #tpu.memory_space<vmem>>, vector<8x128xf32>
    %c0_19 = arith.constant 0 : index
    %c129 = arith.constant 129 : index
    %34 = vector.load %arg6[%c0_19, %c129] : memref<8x384xf32, #tpu.memory_space<vmem>>, vector<8x128xf32>
    %c0_20 = arith.constant 0 : index
    %c134 = arith.constant 134 : index
    %35 = vector.load %arg6[%c0_20, %c134] : memref<8x384xf32, #tpu.memory_space<vmem>>, vector<8x128xf32>
    %c0_21 = arith.constant 0 : index
    %c135 = arith.constant 135 : index
    %36 = vector.load %arg6[%c0_21, %c135] : memref<8x384xf32, #tpu.memory_space<vmem>>, vector<8x128xf32>
    %c0_22 = arith.constant 0 : index
    %c136 = arith.constant 136 : index
    %37 = vector.load %arg6[%c0_22, %c136] : memref<8x384xf32, #tpu.memory_space<vmem>>, vector<8x128xf32>
    %38 = tpu.concatenate %29, %30, %31, %32, %33, %34, %35, %36, %37 in 0 : vector<8x128xf32>, vector<8x128xf32>, vector<8x128xf32>, vector<8x128xf32>, vector<8x128xf32>, vector<8x128xf32>, vector<8x128xf32>, vector<8x128xf32>, vector<8x128xf32> -> vector<72x128xf32>
    %cst_23 = arith.constant dense<0.000000e+00> : vector<16x128xf32>
    %39 = tpu.matmul %7, %38, %cst_23 {dimension_numbers = #tpu.dot_dimension_numbers<[1], [0], [0], [1], [0, 0, 1, 1], [], []>} : vector<16x72xf32>, vector<72x128xf32>, vector<16x128xf32> -> vector<16x128xf32>
    %40 = vector.broadcast %2 : vector<16x1xf32> to vector<16x128xf32>
    %41 = arith.addf %39, %40 : vector<16x128xf32>
    %cst_24 = arith.constant 0.000000e+00 : f32
    %42 = vector.broadcast %cst_24 : f32 to vector<16x128xf32>
    %43 = arith.maximumf %41, %42 : vector<16x128xf32>
    %44 = vector.broadcast %8 : vector<1x128xf32> to vector<16x128xf32>
    %45 = arith.mulf %43, %44 : vector<16x128xf32>
    %46 = tpu.iota {dimensions = array<i32: 0>} : vector<128x128xi32>
    %47 = tpu.iota {dimensions = array<i32: 1>} : vector<128x128xi32>
    %c49_i32 = arith.constant 49 : i32
    %48 = vector.broadcast %c49_i32 : i32 to vector<128x128xi32>
    %49 = arith.muli %47, %48 : vector<128x128xi32>
    %50 = arith.cmpi sge, %46, %49 : vector<128x128xi32>
    %c1_i32 = arith.constant 1 : i32
    %51 = vector.broadcast %c1_i32 : i32 to vector<128x128xi32>
    %52 = arith.addi %47, %51 : vector<128x128xi32>
    %c49_i32_25 = arith.constant 49 : i32
    %53 = vector.broadcast %c49_i32_25 : i32 to vector<128x128xi32>
    %54 = arith.muli %52, %53 : vector<128x128xi32>
    %55 = arith.cmpi slt, %46, %54 : vector<128x128xi32>
    %56 = arith.andi %50, %55 : vector<128x128xi1>
    %cst_26 = arith.constant 0.027777778 : f32
    %cst_27 = arith.constant 0.000000e+00 : f32
    %57 = vector.broadcast %cst_26 : f32 to vector<128x128xf32>
    %58 = vector.broadcast %cst_27 : f32 to vector<128x128xf32>
    %59 = arith.select %56, %57, %58 : vector<128x128xi1>, vector<128x128xf32>
    %cst_28 = arith.constant dense<0.000000e+00> : vector<16x128xf32>
    %60 = tpu.matmul %45, %59, %cst_28 {dimension_numbers = #tpu.dot_dimension_numbers<[1], [0], [0], [1], [0, 0, 1, 1], [], []>} : vector<16x128xf32>, vector<128x128xf32>, vector<16x128xf32> -> vector<16x128xf32>
    %cst_29 = arith.constant dense<0.000000e+00> : vector<16x128xf32>
    %61 = tpu.matmul %5, %60, %cst_29 {dimension_numbers = #tpu.dot_dimension_numbers<[1], [0], [0], [1], [0, 0, 1, 1], [], []>} : vector<16x16xf32>, vector<16x128xf32>, vector<16x128xf32> -> vector<16x128xf32>
    %62 = vector.broadcast %3 : vector<16x1xf32> to vector<16x128xf32>
    %63 = arith.addf %61, %62 : vector<16x128xf32>
    %cst_30 = arith.constant 0.000000e+00 : f32
    %64 = vector.broadcast %cst_30 : f32 to vector<16x128xf32>
    %65 = arith.maximumf %63, %64 : vector<16x128xf32>
    %cst_31 = arith.constant dense<0.000000e+00> : vector<16x128xf32>
    %66 = tpu.matmul %6, %65, %cst_31 {dimension_numbers = #tpu.dot_dimension_numbers<[1], [0], [0], [1], [0, 0, 1, 1], [], []>} : vector<16x16xf32>, vector<16x128xf32>, vector<16x128xf32> -> vector<16x128xf32>
    %67 = vector.broadcast %4 : vector<16x1xf32> to vector<16x128xf32>
    %68 = arith.addf %66, %67 : vector<16x128xf32>
    %c0_32 = arith.constant 0 : index
    %c0_33 = arith.constant 0 : index
    %69 = vector.load %arg5[%c0_32, %c0_33] : memref<16x128xf32, #tpu.memory_space<vmem>>, vector<16x128xf32>
    tpu.vector_store %arg5[%c0_32, %c0_33], %68 {strides = array<i32>} : memref<16x128xf32, #tpu.memory_space<vmem>>, vector<16x128xf32>,
    return
  }
  func.func @transform_0(%arg0: i32) -> (i32, i32) {
    %c0_i32 = arith.constant 0 : i32
    %c0_i32_0 = arith.constant 0 : i32
    return %c0_i32, %arg0 : i32, i32
  }
  func.func @transform_1(%arg0: i32) -> (i32, i32) {
    %c0_i32 = arith.constant 0 : i32
    %c0_i32_0 = arith.constant 0 : i32
    %c0_i32_1 = arith.constant 0 : i32
    return %c0_i32, %c0_i32_0 : i32, i32
  }
  func.func @transform_2(%arg0: i32) -> (i32, i32) {
    %c0_i32 = arith.constant 0 : i32
    %c0_i32_0 = arith.constant 0 : i32
    %c0_i32_1 = arith.constant 0 : i32
    return %c0_i32, %c0_i32_0 : i32, i32
  }
  func.func @transform_3(%arg0: i32) -> (i32, i32) {
    %c0_i32 = arith.constant 0 : i32
    %c0_i32_0 = arith.constant 0 : i32
    %c0_i32_1 = arith.constant 0 : i32
    return %c0_i32, %c0_i32_0 : i32, i32
  }
  func.func @transform_4(%arg0: i32) -> (i32, i32) {
    %c0_i32 = arith.constant 0 : i32
    %c0_i32_0 = arith.constant 0 : i32
    return %c0_i32, %arg0 : i32, i32
  }
}

</mosaic_0001>

<bundles_post_ra>
// kernel: lightweight_sanet_forward.1
= control target key start
LH: loop header
LB: loop body
LE: loop exit
PB: predicated region body
PF: predicated region fallthrough
CT: control target
= control target key end

     0   :  { %s1973_s15 = smov 0   ;;  %s1975_s16 = smov 0   ;;  %s2490_s0 = inlined_call_operand.vmem [shape: bf16[270,1024], index: 0, kind: input, shape index: {}]   ;;  %s2491_s1 = inlined_call_operand.vmem [shape: bf16[8,270], index: 1, kind: input, shape index: {}]   ;;  %s2492_s2 = inlined_call_operand.vmem [shape: f32[1,128], index: 2, kind: input, shape index: {}]   ;;  %s2493_s3 = inlined_call_operand.vmem [shape: f32[16,108], index: 3, kind: input, shape index: {}]   ;;  %s2494_s4 = inlined_call_operand.vmem [shape: f32[16,256], index: 4, kind: output, shape index: {}]  }
   0x1   :  { %s1977_s17 = smov 0  }
   0x2 LB: > { %s1400_s18 = sadd.s32 4294967295, %s1928_s17   ;;  %s1990_s19 = sadd.s32 1, %s1928_s17   ;;  %s1928_s17 = sphi %s1977_s17, %s2500_s17   ;;  %s1924_s16 = sphi %s1975_s16, %s2499_s16   ;;  %s1920_s15 = sphi %s1973_s15, %s2498_s15  }
   0x3   : > { %s18_s20 = ssub.s32 %s1928_s17, %s1990_s19  ;;  %s21_s21 = sadd.s32 1, %s1924_s16 }
   0x4   : > { %p19_p0 = scmp.eq.s32.totalorder %s18_s20, 0  ;;  %p28_p1 = scmp.ne.s32.totalorder %s1924_s16, %s1920_s15 }
   0x5   : > { %p29_p2 = scmp.eq.s32.totalorder %s1928_s17, 0  ;;  %p121_p3 = scmp.eq.s32.totalorder %s1400_s18, 1 }
   0x6   : > { %s2001_s22 = scalar_select %p19_p0, %s1924_s16, %s21_s21  }
   0x7   : > { %p30_p4 = por %p29_p2, %p28_p1  ;;  %p2003_p5 = por %p121_p3, %p28_p1 }
   0x8   : > { %p1403_p6 = scmp.ge.s32.totalorder %s1928_s17, 2 }
   0xa   : > { %152 = sbr.rel (%p1403_p6) target bundleno = 87 (0x57), region = 28 }
   0xf   : > { %155 = sbr.rel (!%p30_p4) target bundleno = 87 (0x57), region = 32  ;;  %s157_s24 = sand.u32 (%p30_p4), 1, %s1924_s16  }
  0x10   : > { %s1710_s25 = sshll.u32 (%p30_p4), %s1928_s17, 4  ;;  %s1779_s26 = smul.u32 (%p30_p4), 544, %s157_s24 }
  0x11   : > { %s2013_s29 = scalar_lea.vmem (%p30_p4), %s2490_s0, %s1710_s25 }
  0x12   : > { %v175_v0 = vld [vmem:[%s2013_s29] sm:$0xff] (%p30_p4)  ;;  %v177_v1 = vld [vmem:[%s2013_s29 + $0x8] sm:$0xff] (%p30_p4)  ;;  %s2018_s30 = scalar_lea.vmem (%p30_p4), [#allocation3], %s1779_s26 }
  0x13   : > { %v179_v2 = vld [vmem:[%s2013_s29 + $0x20] sm:$0xff] (%p30_p4)  ;;  %176 = vst [vmem:[%s2018_s30] sm:$0xff] (%p30_p4), %v175_v0  ;;  %v181_v3 = vld [vmem:[%s2013_s29 + $0x28] sm:$0xff] (%p30_p4) }
  0x14   : > { %178 = vst [vmem:[%s2018_s30 + $0x8] sm:$0xff] %v177_v1  ;;  %v183_v4 = vld [vmem:[%s2013_s29 + $0x40] sm:$0xff]  ;;  %v185_v5 = vld [vmem:[%s2013_s29 + $0x48] sm:$0xff] }
  0x15   : > { %180 = vst [vmem:[%s2018_s30 + $0x10] sm:$0xff] %v179_v2  ;;  %v187_v6 = vld [vmem:[%s2013_s29 + $0x60] sm:$0xff]  ;;  %v189_v7 = vld [vmem:[%s2013_s29 + $0x68] sm:$0xff] }
  0x16   : > { %182 = vst [vmem:[%s2018_s30 + $0x18] sm:$0xff] %v181_v3  ;;  %v191_v8 = vld [vmem:[%s2013_s29 + $0x80] sm:$0xff]  ;;  %v193_v9 = vld [vmem:[%s2013_s29 + $0x88] sm:$0xff] }
  0x17   : > { %184 = vst [vmem:[%s2018_s30 + $0x20] sm:$0xff] %v183_v4  ;;  %v195_v10 = vld [vmem:[%s2013_s29 + $0xa0] sm:$0xff]  ;;  %v197_v11 = vld [vmem:[%s2013_s29 + $0xa8] sm:$0xff] }
  0x18   : > { %186 = vst [vmem:[%s2018_s30 + $0x28] sm:$0xff] %v185_v5  ;;  %v199_v12 = vld [vmem:[%s2013_s29 + $0xc0] sm:$0xff]  ;;  %v201_v13 = vld [vmem:[%s2013_s29 + $0xc8] sm:$0xff] }
  0x19   : > { %188 = vst [vmem:[%s2018_s30 + $0x30] sm:$0xff] %v187_v6  ;;  %v203_v14 = vld [vmem:[%s2013_s29 + $0xe0] sm:$0xff]  ;;  %v205_v15 = vld [vmem:[%s2013_s29 + $0xe8] sm:$0xff] }
  0x1a   : > { %190 = vst [vmem:[%s2018_s30 + $0x38] sm:$0xff] %v189_v7  ;;  %v207_v16 = vld [vmem:[%s2013_s29 + $0x100] sm:$0xff]  ;;  %v209_v17 = vld [vmem:[%s2013_s29 + $0x108] sm:$0xff] }
  0x1b   : > { %192 = vst [vmem:[%s2018_s30 + $0x40] sm:$0xff] %v191_v8  ;;  %v211_v18 = vld [vmem:[%s2013_s29 + $0x120] sm:$0xff]  ;;  %v213_v19 = vld [vmem:[%s2013_s29 + $0x128] sm:$0xff] }
  0x1c   : > { %194 = vst [vmem:[%s2018_s30 + $0x48] sm:$0xff] %v193_v9  ;;  %v215_v20 = vld [vmem:[%s2013_s29 + $0x140] sm:$0xff]  ;;  %v217_v21 = vld [vmem:[%s2013_s29 + $0x148] sm:$0xff] }
  0x1d   : > { %196 = vst [vmem:[%s2018_s30 + $0x50] sm:$0xff] %v195_v10  ;;  %v219_v22 = vld [vmem:[%s2013_s29 + $0x160] sm:$0xff]  ;;  %v221_v23 = vld [vmem:[%s2013_s29 + $0x168] sm:$0xff] }
  0x1e   : > { %198 = vst [vmem:[%s2018_s30 + $0x58] sm:$0xff] %v197_v11  ;;  %v223_v24 = vld [vmem:[%s2013_s29 + $0x180] sm:$0xff]  ;;  %v225_v25 = vld [vmem:[%s2013_s29 + $0x188] sm:$0xff] }
  0x1f   : > { %200 = vst [vmem:[%s2018_s30 + $0x60] sm:$0xff] %v199_v12  ;;  %v227_v26 = vld [vmem:[%s2013_s29 + $0x1a0] sm:$0xff]  ;;  %v229_v27 = vld [vmem:[%s2013_s29 + $0x1a8] sm:$0xff] }
  0x20   : > { %202 = vst [vmem:[%s2018_s30 + $0x68] sm:$0xff] %v201_v13  ;;  %v231_v28 = vld [vmem:[%s2013_s29 + $0x1c0] sm:$0xff]  ;;  %v233_v29 = vld [vmem:[%s2013_s29 + $0x1c8] sm:$0xff] }
  0x21   : > { %204 = vst [vmem:[%s2018_s30 + $0x70] sm:$0xff] %v203_v14  ;;  %v235_v30 = vld [vmem:[%s2013_s29 + $0x1e0] sm:$0xff]  ;;  %v237_v31 = vld [vmem:[%s2013_s29 + $0x1e8] sm:$0xff] }
  0x22   : > { %206 = vst [vmem:[%s2018_s30 + $0x78] sm:$0xff] %v205_v15  ;;  %v239_v32 = vld [vmem:[%s2013_s29 + $0x200] sm:$0xff]  ;;  %v241_v33 = vld [vmem:[%s2013_s29 + $0x208] sm:$0xff] }
  0x23   : > { %208 = vst [vmem:[%s2018_s30 + $0x80] sm:$0xff] %v207_v16  ;;  %v243_v34 = vld [vmem:[%s2013_s29 + $0x220] sm:$0xff]  ;;  %v245_v35 = vld [vmem:[%s2013_s29 + $0x228] sm:$0xff] }
  0x24   : > { %210 = vst [vmem:[%s2018_s30 + $0x88] sm:$0xff] %v209_v17  ;;  %v247_v36 = vld [vmem:[%s2013_s29 + $0x240] sm:$0xff]  ;;  %v249_v37 = vld [vmem:[%s2013_s29 + $0x248] sm:$0xff] }
  0x25   : > { %212 = vst [vmem:[%s2018_s30 + $0x90] sm:$0xff] %v211_v18  ;;  %v251_v38 = vld [vmem:[%s2013_s29 + $0x260] sm:$0xff]  ;;  %v253_v39 = vld [vmem:[%s2013_s29 + $0x268] sm:$0xff] }
  0x26   : > { %214 = vst [vmem:[%s2018_s30 + $0x98] sm:$0xff] %v213_v19  ;;  %v255_v40 = vld [vmem:[%s2013_s29 + $0x280] sm:$0xff]  ;;  %v257_v41 = vld [vmem:[%s2013_s29 + $0x288] sm:$0xff] }
  0x27   : > { %216 = vst [vmem:[%s2018_s30 + $0xa0] sm:$0xff] %v215_v20  ;;  %v259_v42 = vld [vmem:[%s2013_s29 + $0x2a0] sm:$0xff]  ;;  %v261_v43 = vld [vmem:[%s2013_s29 + $0x2a8] sm:$0xff] }
  0x28   : > { %218 = vst [vmem:[%s2018_s30 + $0xa8] sm:$0xff] %v217_v21  ;;  %v263_v44 = vld [vmem:[%s2013_s29 + $0x2c0] sm:$0xff]  ;;  %v265_v45 = vld [vmem:[%s2013_s29 + $0x2c8] sm:$0xff] }
  0x29   : > { %220 = vst [vmem:[%s2018_s30 + $0xb0] sm:$0xff] %v219_v22  ;;  %v267_v46 = vld [vmem:[%s2013_s29 + $0x2e0] sm:$0xff]  ;;  %v269_v47 = vld [vmem:[%s2013_s29 + $0x2e8] sm:$0xff] }
  0x2a   : > { %222 = vst [vmem:[%s2018_s30 + $0xb8] sm:$0xff] %v221_v23  ;;  %v271_v48 = vld [vmem:[%s2013_s29 + $0x300] sm:$0xff]  ;;  %v273_v49 = vld [vmem:[%s2013_s29 + $0x308] sm:$0xff] }
  0x2b   : > { %224 = vst [vmem:[%s2018_s30 + $0xc0] sm:$0xff] %v223_v24  ;;  %v275_v50 = vld [vmem:[%s2013_s29 + $0x320] sm:$0xff]  ;;  %v277_v51 = vld [vmem:[%s2013_s29 + $0x328] sm:$0xff] }
  0x2c   : > { %226 = vst [vmem:[%s2018_s30 + $0xc8] sm:$0xff] %v225_v25  ;;  %v279_v52 = vld [vmem:[%s2013_s29 + $0x340] sm:$0xff]  ;;  %v281_v53 = vld [vmem:[%s2013_s29 + $0x348] sm:$0xff] }
  0x2d   : > { %228 = vst [vmem:[%s2018_s30 + $0xd0] sm:$0xff] %v227_v26  ;;  %v283_v54 = vld [vmem:[%s2013_s29 + $0x360] sm:$0xff]  ;;  %v285_v55 = vld [vmem:[%s2013_s29 + $0x368] sm:$0xff] }
  0x2e   : > { %230 = vst [vmem:[%s2018_s30 + $0xd8] sm:$0xff] %v229_v27  ;;  %v287_v56 = vld [vmem:[%s2013_s29 + $0x380] sm:$0xff]  ;;  %v289_v57 = vld [vmem:[%s2013_s29 + $0x388] sm:$0xff] }
  0x2f   : > { %232 = vst [vmem:[%s2018_s30 + $0xe0] sm:$0xff] %v231_v28  ;;  %v291_v58 = vld [vmem:[%s2013_s29 + $0x3a0] sm:$0xff]  ;;  %v293_v59 = vld [vmem:[%s2013_s29 + $0x3a8] sm:$0xff] }
  0x30   : > { %234 = vst [vmem:[%s2018_s30 + $0xe8] sm:$0xff] %v233_v29  ;;  %v295_v60 = vld [vmem:[%s2013_s29 + $0x3c0] sm:$0xff]  ;;  %v297_v61 = vld [vmem:[%s2013_s29 + $0x3c8] sm:$0xff] }
  0x31   : > { %236 = vst [vmem:[%s2018_s30 + $0xf0] sm:$0xff] %v235_v30  ;;  %v299_v62 = vld [vmem:[%s2013_s29 + $0x3e0] sm:$0xff]  ;;  %v301_v63 = vld [vmem:[%s2013_s29 + $0x3e8] sm:$0xff] }
  0x32   : > { %238 = vst [vmem:[%s2018_s30 + $0xf8] sm:$0xff] %v237_v31  ;;  %v303_v0 = vld [vmem:[%s2013_s29 + $0x400] sm:$0xff]  ;;  %v305_v1 = vld [vmem:[%s2013_s29 + $0x408] sm:$0xff] }
  0x33   : > { %240 = vst [vmem:[%s2018_s30 + $0x100] sm:$0xff] %v239_v32  ;;  %v307_v2 = vld [vmem:[%s2013_s29 + $0x420] sm:$0xff]  ;;  %v309_v3 = vld [vmem:[%s2013_s29 + $0x428] sm:$0xff] }
  0x34   : > { %242 = vst [vmem:[%s2018_s30 + $0x108] sm:$0xff] %v241_v33 }
  0x35   : > { %244 = vst [vmem:[%s2018_s30 + $0x110] sm:$0xff] %v243_v34 }
  0x36   : > { %246 = vst [vmem:[%s2018_s30 + $0x118] sm:$0xff] %v245_v35 }
  0x37   : > { %248 = vst [vmem:[%s2018_s30 + $0x120] sm:$0xff] %v247_v36 }
  0x38   : > { %250 = vst [vmem:[%s2018_s30 + $0x128] sm:$0xff] %v249_v37 }
  0x39   : > { %252 = vst [vmem:[%s2018_s30 + $0x130] sm:$0xff] %v251_v38 }
  0x3a   : > { %254 = vst [vmem:[%s2018_s30 + $0x138] sm:$0xff] %v253_v39 }
  0x3b   : > { %256 = vst [vmem:[%s2018_s30 + $0x140] sm:$0xff] %v255_v40 }
  0x3c   : > { %258 = vst [vmem:[%s2018_s30 + $0x148] sm:$0xff] %v257_v41 }
  0x3d   : > { %260 = vst [vmem:[%s2018_s30 + $0x150] sm:$0xff] %v259_v42 }
  0x3e   : > { %262 = vst [vmem:[%s2018_s30 + $0x158] sm:$0xff] %v261_v43 }
  0x3f   : > { %264 = vst [vmem:[%s2018_s30 + $0x160] sm:$0xff] %v263_v44 }
  0x40   : > { %266 = vst [vmem:[%s2018_s30 + $0x168] sm:$0xff] %v265_v45 }
  0x41   : > { %268 = vst [vmem:[%s2018_s30 + $0x170] sm:$0xff] %v267_v46 }
  0x42   : > { %270 = vst [vmem:[%s2018_s30 + $0x178] sm:$0xff] %v269_v47 }
  0x43   : > { %272 = vst [vmem:[%s2018_s30 + $0x180] sm:$0xff] %v271_v48 }
  0x44   : > { %274 = vst [vmem:[%s2018_s30 + $0x188] sm:$0xff] %v273_v49 }
  0x45   : > { %276 = vst [vmem:[%s2018_s30 + $0x190] sm:$0xff] %v275_v50 }
  0x46   : > { %278 = vst [vmem:[%s2018_s30 + $0x198] sm:$0xff] %v277_v51 }
  0x47   : > { %280 = vst [vmem:[%s2018_s30 + $0x1a0] sm:$0xff] %v279_v52 }
  0x48   : > { %282 = vst [vmem:[%s2018_s30 + $0x1a8] sm:$0xff] %v281_v53 }
  0x49   : > { %284 = vst [vmem:[%s2018_s30 + $0x1b0] sm:$0xff] %v283_v54 }
  0x4a   : > { %286 = vst [vmem:[%s2018_s30 + $0x1b8] sm:$0xff] %v285_v55 }
  0x4b   : > { %288 = vst [vmem:[%s2018_s30 + $0x1c0] sm:$0xff] %v287_v56 }
  0x4c   : > { %290 = vst [vmem:[%s2018_s30 + $0x1c8] sm:$0xff] %v289_v57 }
  0x4d   : > { %292 = vst [vmem:[%s2018_s30 + $0x1d0] sm:$0xff] %v291_v58 }
  0x4e   : > { %294 = vst [vmem:[%s2018_s30 + $0x1d8] sm:$0xff] %v293_v59 }
  0x4f   : > { %296 = vst [vmem:[%s2018_s30 + $0x1e0] sm:$0xff] %v295_v60 }
  0x50   : > { %298 = vst [vmem:[%s2018_s30 + $0x1e8] sm:$0xff] %v297_v61 }
  0x51   : > { %300 = vst [vmem:[%s2018_s30 + $0x1f0] sm:$0xff] %v299_v62 }
  0x52   : > { %302 = vst [vmem:[%s2018_s30 + $0x1f8] sm:$0xff] %v301_v63 }
  0x53   : > { %304 = vst [vmem:[%s2018_s30 + $0x200] sm:$0xff] %v303_v0 }
  0x54   : > { %306 = vst [vmem:[%s2018_s30 + $0x208] sm:$0xff] %v305_v1 }
  0x55   : > { %308 = vst [vmem:[%s2018_s30 + $0x210] sm:$0xff] %v307_v2 }
  0x56   : > { %310 = vst [vmem:[%s2018_s30 + $0x218] sm:$0xff] %v309_v3 }
  0x57 PF: > { %p1406_p7 = scmp.ge.s32.totalorder %s1928_s17, 1  ;;  %p315_p8 = scmp.lt.s32.totalorder %s1928_s17, 3 }
  0x59   : > { %p316_p9 = pnand %p1406_p7, %p315_p8 }
  0x5a   : > { %s322_s5 = sand.u32 (!%p316_p9), 1, %s1920_s15   ;;  %s1931_s21 = smov (!%p316_p9), 119  }
  0x5b   : > { %319 = sbr.rel (%p316_p9) target bundleno = 1161 (0x489), region = 55  ;;  %s1932_s24 = smov (!%p316_p9), 113  }
  0x5c   : > { %s1780_s6 = smul.u32 (!%p316_p9), 544, %s322_s5  ;;  %s1933_s25 = smov (!%p316_p9), 112  }
  0x5d   : > { %s1935_s26 = smov (!%p316_p9), 121   ;;  %s1936_s27 = smov (!%p316_p9), 114  }
  0x5e   : > { %s2161_s9 = scalar_lea.vmem (!%p316_p9), [#allocation3], %s1780_s6  ;;  %s1937_s28 = smov (!%p316_p9), 120  }
  0x5f   : > { %s1938_s29 = smov (!%p316_p9), 127   ;;  %s1939_s30 = smov (!%p316_p9), 126  }
  0x60   : > { %v354_v4 = vld [vmem:[%s2491_s1 + $0x8] sm:$0xf]  ;;  %vm773_vm0 = vcmask 1046528   ;;  %vm769_vm1 = vcmask 113664   ;;  %v1522_v5 = vld [vmem:[%s2161_s9 + $0xe0] sm:$0xf] }
  0x61   : > { %v1741_v6 = vld [vmem:[%s2161_s9 + $0xec] sm:$0xf0]  ;;  %v1650_v7 = vld [vmem:[%s2161_s9 + $0x1e0] sm:$0xf]  ;;  %v427_v8 = vunpack.c.l.b16 %v354_v4  ;;  %v1739_v15 = vld [vmem:[%s2161_s9 + $0xe4] sm:$0xf] }
  0x62   : > { %v1523_v9 = vor.u32 %v1741_v6, %v1522_v5  ;;  %v1773_v10 = vld [vmem:[%s2161_s9 + $0x1ec] sm:$0xf0]  ;;  %v1666_v11 = vld [vmem:[%s2161_s9 + $0x200] sm:$0xf]  ;;  %v1524_v16 = vld [vmem:[%s2161_s9 + $0xf0] sm:$0xf0] }
  0x63   : > { %v1777_v12 = vld [vmem:[%s2161_s9 + $0x20c] sm:$0x70]  ;;  %v1651_v13 = vor.u32 %v1773_v10, %v1650_v7  ;;  %v1771_v17 = vld [vmem:[%s2161_s9 + $0x1e4] sm:$0xf]  ;;  %v1527_v18 = vor.u32 %v1739_v15, %v1524_v16  ;;  %v1652_v19 = vld [vmem:[%s2161_s9 + $0x1f0] sm:$0xf0]  ;;  %v2178_v27 = vpack.c.b16 %v427_v8, %v427_v8 }
  0x64   : > { %v1667_v14 = vor.u32 %v1777_v12, %v1666_v11  ;;  %786 = vmatpush.bf16.msra.mxu0 %v1523_v9  ;;  %v1506_v20 = vld [vmem:[%s2161_s9 + $0xc0] sm:$0xf]  ;;  %v1737_v21 = vld [vmem:[%s2161_s9 + $0xcc] sm:$0xf0]  ;;  %v1655_v23 = vor.u32 %v1771_v17, %v1652_v19  ;;  %v1735_v29 = vld [vmem:[%s2161_s9 + $0xc4] sm:$0xf] }
  0x65   : > { %799 = vmatpush.bf16.msra.mxu1 %v1651_v13  ;;  %v1507_v24 = vor.u32 %v1737_v21, %v1506_v20  ;;  %v1634_v25 = vld [vmem:[%s2161_s9 + $0x1c0] sm:$0xf]  ;;  %v1769_v26 = vld [vmem:[%s2161_s9 + $0x1cc] sm:$0xf0]  ;;  %825 = vmatpush.bf16.msra.mxu3 %v1527_v18  ;;  %v1508_v30 = vld [vmem:[%s2161_s9 + $0xd0] sm:$0xf0] }
  0x66   : > { %v775_v22 = vsel %vm773_vm0, %v1667_v14, 0  ;;  %v1635_v28 = vor.u32 %v1769_v26, %v1634_v25  ;;  %v1767_v31 = vld [vmem:[%s2161_s9 + $0x1c4] sm:$0xf]  ;;  %v1511_v32 = vor.u32 %v1735_v29, %v1508_v30  ;;  %v1636_v33 = vld [vmem:[%s2161_s9 + $0x1d0] sm:$0xf0]  ;;  %vm1001_vm2 = vcmask 924672  }
  0x67   : > { %819 = vmatpush.bf16.msra.mxu2 %v775_v22  ;;  %v1490_v34 = vld [vmem:[%s2161_s9 + $0xa0] sm:$0xf]  ;;  %v1733_v35 = vld [vmem:[%s2161_s9 + $0xac] sm:$0xf0]  ;;  %v1639_v36 = vor.u32 %v1767_v31, %v1636_v33  ;;  %v1731_v40 = vld [vmem:[%s2161_s9 + $0xa4] sm:$0xf] }
  0x68   : > { %787 = vmatpush.bf16.msra.mxu0 %v1507_v24  ;;  %v1491_v37 = vor.u32 %v1733_v35, %v1490_v34  ;;  %v1618_v38 = vld [vmem:[%s2161_s9 + $0x1a0] sm:$0xf]  ;;  %v1765_v39 = vld [vmem:[%s2161_s9 + $0x1ac] sm:$0xf0]  ;;  %v1492_v42 = vld [vmem:[%s2161_s9 + $0xb0] sm:$0xf0] }
  0x69   : > { %800 = vmatpush.bf16.msra.mxu1 %v1635_v28  ;;  %v1619_v41 = vor.u32 %v1765_v39, %v1618_v38  ;;  %v1763_v43 = vld [vmem:[%s2161_s9 + $0x1a4] sm:$0xf]  ;;  %v1620_v44 = vld [vmem:[%s2161_s9 + $0x1b0] sm:$0xf0]  ;;  %826 = vmatpush.bf16.msra.mxu3 %v1511_v32  ;;  %v1495_v45 = vor.u32 %v1731_v40, %v1492_v42  ;;  %v1474_v46 = vld [vmem:[%s2161_s9 + $0x80] sm:$0xf] }
  0x6a   : > { %1680 = vmatmul.msk.bf16.vlgmr.msra.gmra.mxu2 %vm769_vm1, %v2178_v27  ;;  %v1729_v47 = vld [vmem:[%s2161_s9 + $0x8c] sm:$0xf0]  ;;  %v1602_v48 = vld [vmem:[%s2161_s9 + $0x180] sm:$0xf]  ;;  %v1623_v49 = vor.u32 %v1763_v43, %v1620_v44  ;;  %v1727_v51 = vld [vmem:[%s2161_s9 + $0x84] sm:$0xf] }
  0x6b   : > { %838 = vmatpush.bf16.msrb.mxu2 %v1655_v23  ;;  %v1761_v50 = vld [vmem:[%s2161_s9 + $0x18c] sm:$0xf0]  ;;  %v1476_v52 = vld [vmem:[%s2161_s9 + $0x90] sm:$0xf0]  ;;  %v1475_v53 = vor.u32 %v1729_v47, %v1474_v46  ;;  %v1759_v54 = vld [vmem:[%s2161_s9 + $0x184] sm:$0xf] }
  0x6c   : > { %788 = vmatpush.bf16.msra.mxu0 %v1491_v37  ;;  %v1604_v55 = vld [vmem:[%s2161_s9 + $0x190] sm:$0xf0]  ;;  %v1603_v56 = vor.u32 %v1761_v50, %v1602_v48  ;;  %v1458_v57 = vld [vmem:[%s2161_s9 + $0x60] sm:$0xf]  ;;  %v1725_v58 = vld [vmem:[%s2161_s9 + $0x6c] sm:$0xf0]  ;;  %v1479_v59 = vor.u32 %v1727_v51, %v1476_v52 }
  0x6d   : > { %801 = vmatpush.bf16.msra.mxu1 %v1619_v41  ;;  %827 = vmatpush.bf16.msra.mxu3 %v1495_v45  ;;  %v1586_v60 = vld [vmem:[%s2161_s9 + $0x160] sm:$0xf]  ;;  %v1757_v61 = vld [vmem:[%s2161_s9 + $0x16c] sm:$0xf0]  ;;  %v1607_v62 = vor.u32 %v1759_v54, %v1604_v55  ;;  %v1723_v63 = vld [vmem:[%s2161_s9 + $0x64] sm:$0xf]  ;;  %v1459_v1 = vor.u32 %v1725_v58, %v1458_v57 }
  0x6e   : > { %v1460_v0 = vld [vmem:[%s2161_s9 + $0x70] sm:$0xf0]  ;;  %v1755_v2 = vld [vmem:[%s2161_s9 + $0x164] sm:$0xf]  ;;  %v1587_v4 = vor.u32 %v1757_v61, %v1586_v60  ;;  %v1442_v5 = vld [vmem:[%s2161_s9 + $0x40] sm:$0xf] }
  0x6f   : > { %839 = vmatpush.bf16.msrb.mxu2 %v1639_v36  ;;  %v1588_v3 = vld [vmem:[%s2161_s9 + $0x170] sm:$0xf0]  ;;  %v1721_v6 = vld [vmem:[%s2161_s9 + $0x4c] sm:$0xf0]  ;;  %v1463_v7 = vor.u32 %v1723_v63, %v1460_v0  ;;  %v1570_v8 = vld [vmem:[%s2161_s9 + $0x140] sm:$0xf] }
  0x70   : > { %789 = vmatpush.bf16.msra.mxu0 %v1475_v53  ;;  %v1753_v9 = vld [vmem:[%s2161_s9 + $0x14c] sm:$0xf0]  ;;  %v1591_v10 = vor.u32 %v1755_v2, %v1588_v3  ;;  %v1719_v11 = vld [vmem:[%s2161_s9 + $0x44] sm:$0xf]  ;;  %v1444_v12 = vld [vmem:[%s2161_s9 + $0x50] sm:$0xf0]  ;;  %v1443_v13 = vor.u32 %v1721_v6, %v1442_v5 }
  0x71   : > { %802 = vmatpush.bf16.msra.mxu1 %v1603_v56  ;;  %828 = vmatpush.bf16.msra.mxu3 %v1479_v59  ;;  %v1751_v14 = vld [vmem:[%s2161_s9 + $0x144] sm:$0xf]  ;;  %v1572_v15 = vld [vmem:[%s2161_s9 + $0x150] sm:$0xf0]  ;;  %v1571_v16 = vor.u32 %v1753_v9, %v1570_v8  ;;  %v1426_v17 = vld [vmem:[%s2161_s9 + $0x20] sm:$0xf]  ;;  %v1447_v19 = vor.u32 %v1719_v11, %v1444_v12 }
  0x72   : > { %v1717_v18 = vld [vmem:[%s2161_s9 + $0x2c] sm:$0xf0]  ;;  %v1554_v20 = vld [vmem:[%s2161_s9 + $0x120] sm:$0xf]  ;;  %v1575_v22 = vor.u32 %v1751_v14, %v1572_v15  ;;  %v1715_v23 = vld [vmem:[%s2161_s9 + $0x24] sm:$0xf] }
  0x73   : > { %840 = vmatpush.bf16.msrb.mxu2 %v1623_v49  ;;  %v1749_v21 = vld [vmem:[%s2161_s9 + $0x12c] sm:$0xf0]  ;;  %v1428_v24 = vld [vmem:[%s2161_s9 + $0x30] sm:$0xf0]  ;;  %v1427_v25 = vor.u32 %v1717_v18, %v1426_v17  ;;  %v1747_v26 = vld [vmem:[%s2161_s9 + $0x124] sm:$0xf] }
  0x74   : > { %790 = vmatpush.bf16.msra.mxu0 %v1459_v1  ;;  %v1556_v28 = vld [vmem:[%s2161_s9 + $0x130] sm:$0xf0]  ;;  %v353_v29 = vld [vmem:[%s2491_s1] sm:$0xff]  ;;  %v1555_v30 = vor.u32 %v1749_v21, %v1554_v20  ;;  %v1713_v32 = vld [vmem:[%s2161_s9 + $0xc] sm:$0xf0]  ;;  %v1431_v34 = vor.u32 %v1715_v23, %v1428_v24  ;;  %vm1007_vm3 = vcmask 916480  }
  0x75   : > { %803 = vmatpush.bf16.msra.mxu1 %v1587_v4  ;;  %829 = vmatpush.bf16.msra.mxu3 %v1463_v7  ;;  %v1410_v31 = vld [vmem:[%s2161_s9] sm:$0xf]  ;;  %v1745_v35 = vld [vmem:[%s2161_s9 + $0x10c] sm:$0xf0]  ;;  %v1711_v36 = vld [vmem:[%s2161_s9 + $0x4] sm:$0xf]  ;;  %v1559_v38 = vor.u32 %v1747_v26, %v1556_v28  ;;  %v425_v40 = vunpack.c.l.b16 %v353_v29  ;;  %v426_v45 = vunpack.c.h.b16 %v353_v29 }
  0x76   : > { %v1538_v33 = vld [vmem:[%s2161_s9 + $0x100] sm:$0xf]  ;;  %v1412_v37 = vld [vmem:[%s2161_s9 + $0x10] sm:$0xf0]  ;;  %v1743_v39 = vld [vmem:[%s2161_s9 + $0x104] sm:$0xf]  ;;  %v1411_v43 = vor.u32 %v1713_v32, %v1410_v31 }
  0x77   : > { %841 = vmatpush.bf16.msrb.mxu2 %v1607_v62  ;;  %v1530_v41 = vld [vmem:[%s2161_s9 + $0xe8] sm:$0xf]  ;;  %v1742_v42 = vld [vmem:[%s2161_s9 + $0xf4] sm:$0xf0]  ;;  %v1540_v44 = vld [vmem:[%s2161_s9 + $0x110] sm:$0xf0]  ;;  %v1539_v48 = vor.u32 %v1745_v35, %v1538_v33  ;;  %v1415_v51 = vor.u32 %v1711_v36, %v1412_v37  ;;  %v2246_v58 = vpack.c.b16 %v425_v40, %v425_v40  ;;  %v2251_v63 = vpack.c.b16 %v426_v45, %v426_v45 }
  0x78   : > { %791 = vmatpush.bf16.msra.mxu0 %v1443_v13  ;;  %v1775_v46 = vld [vmem:[%s2161_s9 + $0x204] sm:$0xf]  ;;  %v1668_v47 = vld [vmem:[%s2161_s9 + $0x210] sm:$0x70]  ;;  %v1658_v49 = vld [vmem:[%s2161_s9 + $0x1e8] sm:$0xf]  ;;  %v1531_v52 = vor.u32 %v1742_v42, %v1530_v41  ;;  %v1543_v57 = vor.u32 %v1743_v39, %v1540_v44 }
  0x79   : > { %804 = vmatpush.bf16.msra.mxu1 %v1571_v16  ;;  %830 = vmatpush.bf16.msra.mxu3 %v1447_v19  ;;  %v1774_v50 = vld [vmem:[%s2161_s9 + $0x1f4] sm:$0xf0]  ;;  %v1671_v53 = vor.u32 %v1775_v46, %v1668_v47  ;;  %v1740_v54 = vld [vmem:[%s2161_s9 + $0xec] sm:$0xf]  ;;  %v1532_v55 = vld [vmem:[%s2161_s9 + $0xf8] sm:$0xf0] }
  0x7a   : > { %v1674_v56 = vld [vmem:[%s2161_s9 + $0x208] sm:$0xf]  ;;  %v1738_v60 = vld [vmem:[%s2161_s9 + $0xd4] sm:$0xf0]  ;;  %v1535_v61 = vor.u32 %v1740_v54, %v1532_v55  ;;  %v1659_v0 = vor.u32 %v1774_v50, %v1658_v49  ;;  %v1736_v4 = vld [vmem:[%s2161_s9 + $0xcc] sm:$0xf] }
  0x7b   : > { %842 = vmatpush.bf16.msrb.mxu2 %v1591_v10  ;;  %v1514_v59 = vld [vmem:[%s2161_s9 + $0xc8] sm:$0xf]  ;;  %v1778_v62 = vld [vmem:[%s2161_s9 + $0x214] sm:$0x70]  ;;  %v778_v6 = vsel %vm773_vm0, %v1671_v53, 0  ;;  %s1940_s6 = smov 8  }
  0x7c   : > { %792 = vmatpush.bf16.msra.mxu0 %v1427_v25  ;;  %v1675_v1 = vor.u32 %v1778_v62, %v1674_v56  ;;  %v1642_v2 = vld [vmem:[%s2161_s9 + $0x1c8] sm:$0xf]  ;;  %v1770_v3 = vld [vmem:[%s2161_s9 + $0x1d4] sm:$0xf0]  ;;  %v1515_v5 = vor.u32 %v1738_v60, %v1514_v59  ;;  %v1516_v7 = vld [vmem:[%s2161_s9 + $0xd8] sm:$0xf0] }
  0x7d   : > { %805 = vmatpush.bf16.msra.mxu1 %v1555_v30  ;;  %831 = vmatpush.bf16.msra.mxu3 %v1431_v34  ;;  %v1498_v8 = vld [vmem:[%s2161_s9 + $0xa8] sm:$0xf]  ;;  %v1734_v9 = vld [vmem:[%s2161_s9 + $0xb4] sm:$0xf0]  ;;  %v1519_v10 = vor.u32 %v1736_v4, %v1516_v7  ;;  %v1643_v11 = vor.u32 %v1770_v3, %v1642_v2  ;;  %v1732_v13 = vld [vmem:[%s2161_s9 + $0xac] sm:$0xf] }
  0x7e   : > { %v781_v12 = vsel %vm773_vm0, %v1675_v1, 0  ;;  %v1626_v14 = vld [vmem:[%s2161_s9 + $0x1a8] sm:$0xf]  ;;  %v1766_v15 = vld [vmem:[%s2161_s9 + $0x1b4] sm:$0xf0]  ;;  %v1499_v17 = vor.u32 %v1734_v9, %v1498_v8  ;;  %vm989_vm4 = vcmask 973824  }
  0x7f   : > { %843 = vmatpush.bf16.msrb.mxu2 %v1575_v22  ;;  %v1500_v16 = vld [vmem:[%s2161_s9 + $0xb8] sm:$0xf0]  ;;  %v1482_v18 = vld [vmem:[%s2161_s9 + $0x88] sm:$0xf]  ;;  %v1730_v19 = vld [vmem:[%s2161_s9 + $0x94] sm:$0xf0]  ;;  %v1627_v21 = vor.u32 %v1766_v15, %v1626_v14 }
  0x80   : > { %793 = vmatpush.bf16.msra.mxu0 %v1411_v43  ;;  %v1503_v20 = vor.u32 %v1732_v13, %v1500_v16  ;;  %v1728_v22 = vld [vmem:[%s2161_s9 + $0x8c] sm:$0xf]  ;;  %v1484_v23 = vld [vmem:[%s2161_s9 + $0x98] sm:$0xf0]  ;;  %v1610_v24 = vld [vmem:[%s2161_s9 + $0x188] sm:$0xf]  ;;  %v1483_v26 = vor.u32 %v1730_v19, %v1482_v18 }
  0x81   : > { %806 = vmatpush.bf16.msra.mxu1 %v1539_v48  ;;  %832 = vmatpush.bf16.msra.mxu3 %v1415_v51  ;;  %v1762_v25 = vld [vmem:[%s2161_s9 + $0x194] sm:$0xf0]  ;;  %v1466_v28 = vld [vmem:[%s2161_s9 + $0x68] sm:$0xf]  ;;  %v1487_v30 = vor.u32 %v1728_v22, %v1484_v23  ;;  %v1724_v32 = vld [vmem:[%s2161_s9 + $0x6c] sm:$0xf] }
  0x82   : > { %v1726_v29 = vld [vmem:[%s2161_s9 + $0x74] sm:$0xf0]  ;;  %v1611_v31 = vor.u32 %v1762_v25, %v1610_v24  ;;  %v1468_v33 = vld [vmem:[%s2161_s9 + $0x78] sm:$0xf0]  ;;  %v1594_v34 = vld [vmem:[%s2161_s9 + $0x168] sm:$0xf] }
  0x83   : > { %844 = vmatpush.bf16.msrb.mxu2 %v1559_v38  ;;  %794 = vmatmul.bf16.vlgmr.msra.gmra.mxu0 %v2246_v58  ;;  %v1758_v35 = vld [vmem:[%s2161_s9 + $0x174] sm:$0xf0]  ;;  %v1467_v36 = vor.u32 %v1726_v29, %v1466_v28  ;;  %v1772_v37 = vld [vmem:[%s2161_s9 + $0x1ec] sm:$0xf]  ;;  %v1450_v38 = vld [vmem:[%s2161_s9 + $0x48] sm:$0xf]  ;;  %v1471_v40 = vor.u32 %v1724_v32, %v1468_v33 }
  0x84   : > { %903 = vmatpush.bf16.msrb.mxu0 %v1535_v61  ;;  %807 = vmatmul.bf16.vlgmr.msra.gmra.mxu1 %v2251_v63  ;;  %v1722_v39 = vld [vmem:[%s2161_s9 + $0x54] sm:$0xf0]  ;;  %v1595_v41 = vor.u32 %v1758_v35, %v1594_v34  ;;  %v1660_v42 = vld [vmem:[%s2161_s9 + $0x1f8] sm:$0xf0]  ;;  %v1720_v43 = vld [vmem:[%s2161_s9 + $0x4c] sm:$0xf] }
  0x85   : > { %864 = vmatpush.bf16.msrb.mxu1 %v1531_v52  ;;  %877 = vmatpush.bf16.msrb.mxu3 %v1659_v0  ;;  %v1452_v44 = vld [vmem:[%s2161_s9 + $0x58] sm:$0xf0]  ;;  %v1578_v45 = vld [vmem:[%s2161_s9 + $0x148] sm:$0xf]  ;;  %v1754_v46 = vld [vmem:[%s2161_s9 + $0x154] sm:$0xf0]  ;;  %v1451_v47 = vor.u32 %v1722_v39, %v1450_v38  ;;  %v1663_v48 = vor.u32 %v1772_v37, %v1660_v42 }
  0x86   : > { %833 = vmatmul.bf16.vlgmr.msra.gmra.mxu3 %v2246_v58  ;;  %v1768_v49 = vld [vmem:[%s2161_s9 + $0x1cc] sm:$0xf]  ;;  %v1434_v50 = vld [vmem:[%s2161_s9 + $0x28] sm:$0xf]  ;;  %v1718_v51 = vld [vmem:[%s2161_s9 + $0x34] sm:$0xf0]  ;;  %v1455_v52 = vor.u32 %v1720_v43, %v1452_v44  ;;  %v1579_v53 = vor.u32 %v1754_v46, %v1578_v45 }
  0x87   : > { %845 = vmatpush.bf16.msrb.mxu2 %v1543_v57  ;;  %v1644_v54 = vld [vmem:[%s2161_s9 + $0x1d8] sm:$0xf0]  ;;  %v1716_v55 = vld [vmem:[%s2161_s9 + $0x2c] sm:$0xf]  ;;  %v1562_v57 = vld [vmem:[%s2161_s9 + $0x128] sm:$0xf]  ;;  %v1435_v60 = vor.u32 %v1718_v51, %v1434_v50 }
  0x88   : > { %904 = vmatpush.bf16.msrb.mxu0 %v1519_v10  ;;  %v1436_v56 = vld [vmem:[%s2161_s9 + $0x38] sm:$0xf0]  ;;  %v1750_v59 = vld [vmem:[%s2161_s9 + $0x134] sm:$0xf0]  ;;  %v1776_v61 = vld [vmem:[%s2161_s9 + $0x20c] sm:$0xf]  ;;  %v1647_v1 = vor.u32 %v1768_v49, %v1644_v54 }
  0x89   : > { %865 = vmatpush.bf16.msrb.mxu1 %v1515_v5  ;;  %878 = vmatpush.bf16.msrb.mxu3 %v1643_v11  ;;  %v1676_v62 = vld [vmem:[%s2161_s9 + $0x218] sm:$0x70]  ;;  %v2304_v0 = vld [vmem:[%s2493_s3] sm:$0xff]  ;;  %v1764_v2 = vld [vmem:[%s2161_s9 + $0x1ac] sm:$0xf]  ;;  %v1439_v5 = vor.u32 %v1716_v55, %v1436_v56  ;;  %v1930_v10 = vmov 0  }
  0x8a   : > { %846 = vmatmul.bf16.vlgmr.msrb.gmra.mxu2 %v2251_v63  ;;  %v1418_v3 = vld [vmem:[%s2161_s9 + $0x8] sm:$0xf]  ;;  %v1714_v4 = vld [vmem:[%s2161_s9 + $0x14] sm:$0xf0]  ;;  %v1628_v7 = vld [vmem:[%s2161_s9 + $0x1b8] sm:$0xf0]  ;;  %1823 = vset.pattern.permute.xlu0 %v1930_v10  ;;  %v1679_v13 = vor.u32 %v1776_v61, %v1676_v62 }
  0x8b   : > { %858 = vmatpush.bf16.msra.mxu2 %v778_v6  ;;  %v1563_v6 = vor.u32 %v1750_v59, %v1562_v57  ;;  %v1712_v8 = vld [vmem:[%s2161_s9 + $0xc] sm:$0xf]  ;;  %v1420_v9 = vld [vmem:[%s2161_s9 + $0x18] sm:$0xf0]  ;;  %v1546_v11 = vld [vmem:[%s2161_s9 + $0x108] sm:$0xf]  ;;  %947 = vperm.xlu0 %1823, %v2304_v0   ;;  %v1419_v14 = vor.u32 %v1714_v4, %v1418_v3  ;;  %v1631_v15 = vor.u32 %v1764_v2, %v1628_v7 }
  0x8c   : > { %905 = vmatpush.bf16.msrb.mxu0 %v1503_v20  ;;  %v1423_v16 = vor.u32 %v1712_v8, %v1420_v9  ;;  %v1760_v18 = vld [vmem:[%s2161_s9 + $0x18c] sm:$0xf]  ;;  %v1612_v19 = vld [vmem:[%s2161_s9 + $0x198] sm:$0xf0]  ;;  %v784_v20 = vsel %vm773_vm0, %v1679_v13, 0  ;;  %vm995_vm5 = vcmask 932864  }
  0x8d   : > { %866 = vmatpush.bf16.msrb.mxu1 %v1499_v17  ;;  %879 = vmatpush.bf16.msrb.mxu3 %v1627_v21  ;;  %v1615_v21 = vor.u32 %v1760_v18, %v1612_v19  ;;  %v1756_v22 = vld [vmem:[%s2161_s9 + $0x16c] sm:$0xf]  ;;  %v1596_v23 = vld [vmem:[%s2161_s9 + $0x178] sm:$0xf0]  ;;  %v2337_v7 = vld [vmem:[%s2492_s2] ss:$0 sm:$0xff] }
  0x8e   : > { %v1599_v24 = vor.u32 %v1756_v22, %v1596_v23  ;;  %v1752_v25 = vld [vmem:[%s2161_s9 + $0x14c] sm:$0xf]  ;;  %v1548_v33 = vld [vmem:[%s2161_s9 + $0x118] sm:$0xf0]  ;;  %vm979_vm6 = vcmask 990208   ;;  %vm967_vm7 = vcmask 1039360  }
  0x8f   : > { %897 = vmatpush.bf16.msrb.mxu2 %v781_v12  ;;  %v1746_v12 = vld [vmem:[%s2161_s9 + $0x114] sm:$0xf0]  ;;  %v1748_v29 = vld [vmem:[%s2161_s9 + $0x12c] sm:$0xf]  ;;  %vm973_vm8 = vcmask 1031168   ;;  %vm1056_vm9 = vcmask 64512  }
  0x90   : > { %906 = vmatpush.bf16.msrb.mxu0 %v1487_v30  ;;  %v1547_v17 = vor.u32 %v1746_v12, %v1546_v11  ;;  %v1564_v30 = vld [vmem:[%s2161_s9 + $0x138] sm:$0xf0]  ;;  %v1744_v32 = vld [vmem:[%s2161_s9 + $0x10c] sm:$0xf]  ;;  %v1934_v12 = vmov 0.0   ;;  %s1944_s10 = smov 124  }
  0x91   : > { %867 = vmatpush.bf16.msrb.mxu1 %v1483_v26  ;;  %880 = vmatpush.bf16.msrb.mxu3 %v1611_v31  ;;  %v1580_v26 = vld [vmem:[%s2161_s9 + $0x158] sm:$0xf0]  ;;  %v1567_v31 = vor.u32 %v1748_v29, %v1564_v30  ;;  %v1551_v34 = vor.u32 %v1744_v32, %v1548_v33  ;;  %s1941_s9 = smov 92   ;;  %s1945_s11 = smov 108  }
  0x92   : > { %v1583_v28 = vor.u32 %v1752_v25, %v1580_v26  ;;  %s1407_s12 = sshll.u32 %s322_s5, 4  ;;  %s1707_s14 = sshll.u32 (%p2003_p5), %s1400_s18, 3 }
  0x93   : > { %s345_s13 = scalar_lea.vmem [#allocation4], %s1407_s12  ;;  %s1306_s5 = scalar_lea.vmem (%p2003_p5), %s2494_s4, %s1707_s14 }
  0x94   : > { %907 = vmatpush.bf16.msrb.mxu0 %v1471_v40 }
  0x95   : > { %868 = vmatpush.bf16.msrb.mxu1 %v1467_v36  ;;  %881 = vmatpush.bf16.msrb.mxu3 %v1595_v41 }
  0x98   : > { %908 = vmatpush.bf16.msrb.mxu0 %v1455_v52 }
  0x99   : > { %869 = vmatpush.bf16.msrb.mxu1 %v1451_v47  ;;  %882 = vmatpush.bf16.msrb.mxu3 %v1579_v53 }
  0x9a   : > { %1681 = vmatmul.msk.bf16.vlgmr.msra.gmra.mxu2 %vm769_vm1, %v2178_v27 }
  0x9b   : > { %916 = vmatpush.bf16.msra.mxu2 %v1663_v48 }
  0x9c   : > { %909 = vmatpush.bf16.msrb.mxu0 %v1439_v5 }
  0x9d   : > { %870 = vmatpush.bf16.msrb.mxu1 %v1435_v60  ;;  %883 = vmatpush.bf16.msrb.mxu3 %v1563_v6 }
  0x9f   : > { %917 = vmatpush.bf16.msra.mxu2 %v1647_v1 }
  0xa0   : > { %910 = vmatpush.bf16.msrb.mxu0 %v1423_v16 }
  0xa1   : > { %871 = vmatpush.bf16.msrb.mxu1 %v1419_v14  ;;  %884 = vmatpush.bf16.msrb.mxu3 %v1547_v17 }
  0xa3   : > { %918 = vmatpush.bf16.msra.mxu2 %v1631_v15  ;;  %911 = vmatmul.bf16.vlgmr.msrb.gmra.mxu0 %v2246_v58 }
  0xa4   : > { %872 = vmatmul.bf16.vlgmr.msrb.gmra.mxu1 %v2246_v58  ;;  %885 = vmatmul.bf16.vlgmr.msrb.gmra.mxu3 %v2251_v63 }
  0xa5   : > { %936 = vmatpush.bf16.msra.mxu1 %v784_v20 }
  0xa7   : > { %919 = vmatpush.bf16.msra.mxu2 %v1615_v21 }
  0xaa   : > { %1682 = vmatmul.msk.bf16.vlgmr.msrb.gmra.mxu2 %vm769_vm1, %v2178_v27 }
  0xab   : > { %920 = vmatpush.bf16.msra.mxu2 %v1599_v24 }
  0xaf   : > { %921 = vmatpush.bf16.msra.mxu2 %v1583_v28 }
  0xb3   : > { %922 = vmatpush.bf16.msra.mxu2 %v1567_v31 }
  0xb4   : > { %1683 = vmatmul.msk.bf16.vlgmr.msra.gmra.mxu1 %vm769_vm1, %v2178_v27 }
  0xb7   : > { %923 = vmatpush.bf16.msra.mxu2 %v1551_v34 }
  0xba   : > { %924 = vmatmul.bf16.vlgmr.msra.gmra.mxu2 %v2251_v63 }
  0xed   : > { %v821_v58 = vpop.f32.mrf.mxu2 }
  0xf5   : > { %v823_v35 = vpop.f32.mrf.mxu2 }
  0xfd   : > { %v948_v4 = vpop.permute.xlu0 %947 }
 0x100   : > { %v795_v36 = vpop.f32.mrf.mxu0 }
 0x101   : > { %v808_v37 = vpop.f32.mrf.mxu1 }
 0x102   : > { %v809_v54 = vadd.f32 %v808_v37, %v795_v36 }
 0x104   : > { %v822_v61 = vadd.f32 %v821_v58, %v809_v54 }
 0x108   : > { %v797_v39 = vpop.f32.mrf.mxu0 }
 0x109   : > { %v834_v38 = vpop.f32.mrf.mxu3  ;;  %v810_v41 = vpop.f32.mrf.mxu1 }
 0x10d   : > { %v847_v40 = vpop.f32.mrf.mxu2 }
 0x10e   : > { %v848_v55 = vadd.f32 %v847_v40, %v834_v38 }
 0x111   : > { %v836_v42 = vpop.f32.mrf.mxu3 }
 0x115   : > { %v849_v43 = vpop.f32.mrf.mxu2 }
 0x11d   : > { %v860_v44 = vpop.f32.mrf.mxu2 }
 0x11e   : > { %v861_v59 = vadd.f32 %v860_v44, %v848_v55 }
 0x120   : > { %v912_v46 = vpop.f32.mrf.mxu0  ;;  %v942_v2 = vmax.f32 %v822_v61, %v861_v59 }
 0x121   : > { %v873_v45 = vpop.f32.mrf.mxu1 }
 0x125   : > { %v862_v47 = vpop.f32.mrf.mxu2 }
 0x127   : > { %v886_v48 = vpop.f32.mrf.mxu3 }
 0x128   : > { %v914_v27 = vpop.f32.mrf.mxu0  ;;  %v887_v56 = vadd.f32 %v886_v48, %v873_v45 }
 0x129   : > { %v875_v49 = vpop.f32.mrf.mxu1 }
 0x12d   : > { %v899_v50 = vpop.f32.mrf.mxu2 }
 0x12e   : > { %v900_v62 = vadd.f32 %v899_v50, %v887_v56  ;;  %v2356_v50 = vld [vmem:[%s2493_s3 + $0x8] sm:$0xff] }
 0x12f   : > { %v888_v63 = vpop.f32.mrf.mxu3 }
 0x131   : > { %v938_v51 = vpop.f32.mrf.mxu1 }
 0x135   : > { %v901_v52 = vpop.f32.mrf.mxu2 }
 0x139   : > { %v940_v53 = vpop.f32.mrf.mxu1 }
 0x13d   : > { %v925_v57 = vpop.f32.mrf.mxu2 }
 0x13e   : > { %v926_v60 = vadd.f32 %v925_v57, %v912_v46  ;;  %v1106_v57 = vlaneseq }
 0x140   : > { %v939_v1 = vadd.f32 %v938_v51, %v926_v60  ;;  %v1942_v60 = vmov 1  }
 0x141   : > { %1900 = vset.pattern.permute.xlu0 %v1942_v60  ;;  %1899 = vset.pattern.permute.xlu2 %v1942_v60 }
 0x142   : > { %v943_v3 = vmax.f32 %v900_v62, %v939_v1  ;;  %v2365_v1 = vshrl.u32 %v1106_v57, 7 }
 0x144   : > { %v944_v5 = vmax.f32 %v942_v2, %v943_v3  ;;  %v1124_v2 = vand.u32 127, %v1106_v57 }
 0x145   : > { %v927_v6 = vpop.f32.mrf.mxu2 }
 0x146   : > { %v950_v8 = vadd.f32 %v948_v4, %v944_v5  ;;  %v1122_v4 = vadd.s32 120, %v2365_v1  ;;  %v2369_v5 = vmul.u32 49, %v1124_v2  ;;  %v1142_v6 = vadd.s32 1, %v1124_v2 }
 0x148   : > { %v951_v9 = vmax.f32 %v950_v8, 0.0  ;;  %v1121_v8 = vadd.s32 112, %v2365_v1  ;;  %vm1141_vm10 = vcmp.ge.s32.totalorder %v1122_v4, %v2369_v5 }
 0x14a   : > { %v2340_v10 = vmul.f32 %v2337_v7, %v951_v9  ;;  %v1120_v9 = vadd.s32 104, %v2365_v1  ;;  %vm1140_vm11 = vcmp.ge.s32.totalorder %v1121_v8, %v2369_v5 }
 0x14c   : > { %v1839_v11 = vpack.i.bf16 0.0, %v2340_v10  ;;  %v1844_v13 = vpack.i.bf16 %v2340_v10, %v1934_v12  ;;  %v2375_v12 = vmul.u32 49, %v1142_v6  ;;  %vm1139_vm12 = vcmp.ge.s32.totalorder %v1120_v9, %v2369_v5 }
 0x14e   : > { %1840 = vrot.lane.b32.xlu2 %v1839_v11, %s1931_s21  ;;  %1830 = vrot.lane.b32.xlu1 %v1839_v11, %s1932_s24  ;;  %vm1159_vm13 = vcmp.lt.s32.totalorder %v1122_v4, %v2375_v12  ;;  %vm1158_vm14 = vcmp.lt.s32.totalorder %v1121_v8, %v2375_v12  ;;  %vm1157_vm0 = vcmp.lt.s32.totalorder %v1120_v9, %v2375_v12 }
 0x14f   : > { %1825 = vrot.lane.b32.xlu0 %v1839_v11, %s1933_s25  ;;  %vm1175_vm15 = vmand %vm1141_vm10, %vm1159_vm13 }
 0x150   : > { %vm1174_vm1 = vmand %vm1140_vm11, %vm1158_vm14 }
 0x156   : > { %1845 = vrot.lane.b32.xlu2 %v1844_v13, %s1935_s26  ;;  %1835 = vrot.lane.b32.xlu1 %v1839_v11, %s1936_s27 }
 0x157   : > { %981 = vrot.lane.b32.xlu0 %v2340_v10, %s1937_s28 }
 0x15e   : > { %1855 = vrot.lane.b32.xlu2 %v1844_v13, %s1938_s29  ;;  %1850 = vrot.lane.b32.xlu1 %v1844_v13, %s1939_s30  ;;  %v1119_v13 = vadd.s32 96, %v2365_v1 }
 0x1a8   : > { %v1841_v14 = vpop.permute.xlu2 %1840 }
 0x1a9   : > { %v1843_v26 = vunpack.i.h.bf16 %v1841_v14  ;;  %v1842_v28 = vunpack.i.l.bf16 %v1841_v14 }
 0x1ab   : > { %v990_v58 = vsel %vm989_vm4, %v1842_v28, %v1843_v26  ;;  %vm1173_vm4 = vmand %vm1139_vm12, %vm1157_vm0 }
 0x1ac   : > { %v1874_v40 = vpack.i.bf16 %v990_v58, %v1842_v28 }
 0x1b0   : > { %v1846_v16 = vpop.permute.xlu2 %1845 }
 0x1b1   : > { %v1848_v29 = vunpack.i.h.bf16 %v1846_v16  ;;  %v1847_v30 = vunpack.i.l.bf16 %v1846_v16 }
 0x1b3   : > { %v980_v37 = vsel %vm979_vm6, %v1847_v30, %v1848_v29  ;;  %v1115_v30 = vadd.s32 64, %v2365_v1 }
 0x1b5   : > { %vm1152_vm0 = vcmp.lt.s32.totalorder %v1115_v30, %v2375_v12 }
 0x1b8   : > { %v1856_v35 = vpop.permute.xlu2 %1855 }
 0x1b9   : > { %v1858_v41 = vunpack.i.h.bf16 %v1856_v35  ;;  %v1857_v42 = vunpack.i.l.bf16 %v1856_v35  ;;  %v1114_v35 = vadd.s32 56, %v2365_v1 }
 0x1bb   : > { %v968_v46 = vsel %vm967_vm7, %v1857_v42, %v1858_v41  ;;  %v1884_v49 = vpack.i.bf16 0.0, %v1858_v41 }
 0x1c0   : > { %v1831_v15 = vpop.permute.xlu1 %1830 }
 0x1c1   : > { %v1833_v17 = vunpack.i.h.bf16 %v1831_v15  ;;  %v1832_v18 = vunpack.i.l.bf16 %v1831_v15  ;;  %v1826_v19 = vpop.permute.xlu0 %1825  ;;  %v1118_v15 = vadd.s32 88, %v2365_v1 }
 0x1c2   : > { %v1828_v20 = vunpack.i.h.bf16 %v1826_v19  ;;  %v1827_v21 = vunpack.i.l.bf16 %v1826_v19  ;;  %v1117_v19 = vadd.s32 80, %v2365_v1 }
 0x1c3   : > { %v1002_v22 = vsel %vm1001_vm2, %v1832_v18, %v1833_v17  ;;  %vm1138_vm2 = vcmp.ge.s32.totalorder %v1119_v13, %v2369_v5  ;;  %vm1155_vm6 = vcmp.lt.s32.totalorder %v1118_v15, %v2375_v12 }
 0x1c4   : > { %v1864_v23 = vpack.i.bf16 %v1002_v22, %v1832_v18  ;;  %v1008_v24 = vsel %vm1007_vm3, %v1827_v21, %v1828_v20  ;;  %v1943_v22 = vmov 0.027777778   ;;  %vm1156_vm3 = vcmp.lt.s32.totalorder %v1119_v13, %v2375_v12 }
 0x1c5   : > { %v1859_v25 = vpack.i.bf16 %v1008_v24, %v1827_v21  ;;  %1686 = vmatpush.msk.msra.mxu0 %vm1175_vm15, %v1943_v22  ;;  %v1116_v24 = vadd.s32 72, %v2365_v1  ;;  %vm2397_vm7 = vmand %vm1138_vm2, %vm1156_vm3  ;;  %vm1154_vm10 = vcmp.lt.s32.totalorder %v1117_v19, %v2375_v12  ;;  %vm1134_vm15 = vcmp.ge.s32.totalorder %v1115_v30, %v2369_v5 }
 0x1c6   : > { %1865 = vrot.lane.b32.xlu1 %v1864_v23, %s1940_s6  ;;  %vm1133_vm2 = vcmp.ge.s32.totalorder %v1114_v35, %v2369_v5  ;;  %vm1151_vm3 = vcmp.lt.s32.totalorder %v1114_v35, %v2375_v12 }
 0x1c7   : > { %1860 = vrot.lane.b32.xlu0 %v1859_v25, %s1940_s6  ;;  %1687 = vmatpush.msk.msra.mxu0 %vm1174_vm1, %v1943_v22  ;;  %vm1135_vm12 = vcmp.ge.s32.totalorder %v1116_v24, %v2369_v5  ;;  %vm1153_vm13 = vcmp.lt.s32.totalorder %v1116_v24, %v2375_v12 }
 0x1c8   : > { %v1836_v31 = vpop.permute.xlu1 %1835  ;;  %vm1169_vm1 = vmand %vm1135_vm12, %vm1153_vm13 }
 0x1c9   : > { %v1838_v32 = vunpack.i.h.bf16 %v1836_v31  ;;  %v1837_v33 = vunpack.i.l.bf16 %v1836_v31  ;;  %v982_v34 = vpop.permute.xlu0 %981  ;;  %1688 = vmatpush.msk.msra.mxu0 %vm1173_vm4, %v1943_v22  ;;  %vm1074_vm4 = vcmask 588800  }
 0x1ca   : > { %v1879_v39 = vpack.i.bf16 %v980_v37, %v982_v34 }
 0x1cb   : > { %v996_v36 = vsel %vm995_vm5, %v1837_v33, %v1838_v32  ;;  %vm1137_vm5 = vcmp.ge.s32.totalorder %v1118_v15, %v2369_v5  ;;  %1689 = vmatpush.msk.msra.mxu0 %vm2397_vm7, %v1943_v22 }
 0x1cc   : > { %v1869_v38 = vpack.i.bf16 %v996_v36, %v1837_v33  ;;  %vm1171_vm11 = vmand %vm1137_vm5, %vm1155_vm6  ;;  %v1113_v36 = vadd.s32 48, %v2365_v1 }
 0x1cd   : > { %1690 = vmatpush.msk.msra.mxu0 %vm1171_vm11, %v1943_v22  ;;  %vm1168_vm5 = vmand %vm1134_vm15, %vm1152_vm0 }
 0x1ce   : > { %1870 = vrot.lane.b32.xlu2 %v1869_v38, %s1940_s6  ;;  %1880 = vrot.lane.b32.xlu1 %v1879_v39, %s1940_s6  ;;  %vm1132_vm6 = vcmp.ge.s32.totalorder %v1113_v36, %v2369_v5  ;;  %vm1150_vm7 = vcmp.lt.s32.totalorder %v1113_v36, %v2375_v12 }
 0x1cf   : > { %1875 = vrot.lane.b32.xlu0 %v1874_v40, %s1940_s6  ;;  %v1112_v40 = vadd.s32 40, %v2365_v1 }
 0x1d0   : > { %v1851_v43 = vpop.permute.xlu1 %1850 }
 0x1d1   : > { %v1853_v44 = vunpack.i.h.bf16 %v1851_v43  ;;  %v1852_v45 = vunpack.i.l.bf16 %v1851_v43  ;;  %v1111_v43 = vadd.s32 32, %v2365_v1  ;;  %vm1149_vm11 = vcmp.lt.s32.totalorder %v1112_v40, %v2375_v12 }
 0x1d3   : > { %v1894_v47 = vpack.i.bf16 %v968_v46, %v1853_v44  ;;  %v974_v48 = vsel %vm973_vm8, %v1852_v45, %v1853_v44  ;;  %vm1136_vm8 = vcmp.ge.s32.totalorder %v1117_v19, %v2369_v5  ;;  %v1110_v45 = vadd.s32 24, %v2365_v1 }
 0x1d4   : > { %v1889_v27 = vpack.i.bf16 %v974_v48, %v1848_v29  ;;  %vm1170_vm14 = vmand %vm1136_vm8, %vm1154_vm10  ;;  %vm1131_vm10 = vcmp.ge.s32.totalorder %v1112_v40, %v2369_v5  ;;  %vm1130_vm12 = vcmp.ge.s32.totalorder %v1111_v43, %v2369_v5  ;;  %vm1148_vm13 = vcmp.lt.s32.totalorder %v1111_v43, %v2375_v12 }
 0x1d5   : > { %1691 = vmatpush.msk.msra.mxu0 %vm1170_vm14, %v1943_v22  ;;  %vm1167_vm8 = vmand %vm1133_vm2, %vm1151_vm3  ;;  %vm1129_vm15 = vcmp.ge.s32.totalorder %v1110_v45, %v2369_v5  ;;  %vm1147_vm0 = vcmp.lt.s32.totalorder %v1110_v45, %v2375_v12  ;;  %v1108_v48 = vadd.s32 8, %v2365_v1 }
 0x1d6   : > { %1890 = vrot.lane.b32.xlu2 %v1889_v27, %s1940_s6  ;;  %1885 = vrot.lane.b32.xlu1 %v1884_v49, %s1940_s6  ;;  %vm1165_vm14 = vmand %vm1131_vm10, %vm1149_vm11  ;;  %vm1126_vm10 = vcmp.ge.s32.totalorder %v2365_v1, %v2369_v5  ;;  %vm1144_vm11 = vcmp.lt.s32.totalorder %v2365_v1, %v2375_v12 }
 0x1d7   : > { %1895 = vrot.lane.b32.xlu0 %v1894_v47, %s1940_s6  ;;  %1692 = vmatpush.msk.msra.mxu0 %vm1169_vm1, %v1943_v22  ;;  %vm1164_vm1 = vmand %vm1130_vm12, %vm1148_vm13  ;;  %v1109_v47 = vadd.s32 16, %v2365_v1  ;;  %vm1227_vm12 = vcmask 130048   ;;  %v1947_v1 = vmov 3  }
 0x1d8   : > { %vm1163_vm2 = vmand %vm1129_vm15, %vm1147_vm0 }
 0x1d9   : > { %1693 = vmatpush.msk.msra.mxu0 %vm1168_vm5, %v1943_v22  ;;  %vm1128_vm3 = vcmp.ge.s32.totalorder %v1109_v47, %v2369_v5  ;;  %vm1146_vm5 = vcmp.lt.s32.totalorder %v1109_v47, %v2375_v12 }
 0x1db   : > { %1694 = vmatpush.msk.msra.mxu0 %vm1167_vm8, %v1943_v22 }
 0x1de   : > { %1024 = vrot.lane.b32.xlu2 %v2340_v10, %s1940_s6  ;;  %1020 = vrot.lane.b32.xlu1 %v2356_v50, %s1941_s9 }
 0x1df   : > { %1018 = vrot.lane.b32.xlu0 %v2304_v0, %s1941_s9 }
 0x1e6   : > { %1010 = vperm.xlu2 %1899, %v2304_v0   ;;  %1223 = vrot.lane.b32.xlu1 %v2304_v0, %s1944_s10 }
 0x1e7   : > { %1015 = vperm.xlu0 %1900, %v2356_v50  }
 0x1ee   : > { %1225 = vrot.lane.b32.xlu2 %v2356_v50, %s1944_s10 }
 0x1ef   : > { %1265 = vrot.lane.b32.xlu0 %v2304_v0, %s1945_s11 }
 0x1f0   : > { %1904 = vset.pattern.permute.xlu0 %v1947_v1 }
 0x1f7   : > { %1262 = vperm.xlu0 %1904, %v2356_v50  }
 0x228   : > { %v1871_v51 = vpop.permute.xlu2 %1870 }
 0x229   : > { %v1873_v59 = vunpack.i.h.bf16 %v1871_v51  ;;  %v1872_v61 = vunpack.i.l.bf16 %v1871_v51 }
 0x22b   : > { %v1062_v11 = vsel %vm1056_vm9, %v1872_v61, %v1873_v59  ;;  %v1946_v59 = vmov 2  }
 0x22c   : > { %1901 = vset.pattern.permute.xlu1 %v1946_v59  ;;  %1902 = vset.pattern.permute.xlu2 %v1946_v59 }
 0x22d   : > { %1220 = vperm.xlu1 %1901, %v2356_v50   ;;  %1216 = vperm.xlu2 %1902, %v2304_v0  }
 0x230   : > { %v1891_v18 = vpop.permute.xlu2 %1890 }
 0x231   : > { %v1892_v25 = vunpack.i.l.bf16 %v1891_v18  ;;  %v1893_v31 = vunpack.i.h.bf16 %v1891_v18 }
 0x235   : > { %1267 = vrot.lane.b32.xlu1 %v2356_v50, %s1945_s11  ;;  %1903 = vset.pattern.permute.xlu2 %v1947_v1 }
 0x236   : > { %1258 = vperm.xlu2 %1903, %v2304_v0  }
 0x238   : > { %v1866_v63 = vpop.permute.xlu1 %1865  ;;  %v1025_v41 = vpop.permute.xlu2 %1024 }
 0x239   : > { %v1868_v52 = vunpack.i.h.bf16 %v1866_v63  ;;  %v1867_v53 = vunpack.i.l.bf16 %v1866_v63  ;;  %v1861_v54 = vpop.permute.xlu0 %1860 }
 0x23a   : > { %v1863_v55 = vunpack.i.h.bf16 %v1861_v54  ;;  %v1862_v56 = vunpack.i.l.bf16 %v1861_v54 }
 0x23b   : > { %v1063_v3 = vsel %vm1056_vm9, %v1867_v53, %v1868_v52 }
 0x23c   : > { %v1064_v62 = vsel %vm1056_vm9, %v1862_v56, %v1863_v55 }
 0x23d   : > { %1086 = vmatpush.msra.mxu3 %v1064_v62 }
 0x23f   : > { %1087 = vmatpush.msra.mxu3 %v1063_v3 }
 0x240   : > { %v1881_v10 = vpop.permute.xlu1 %1880  ;;  %v1011_v49 = vpop.permute.xlu2 %1010 }
 0x241   : > { %v1876_v14 = vpop.permute.xlu0 %1875  ;;  %1088 = vmatpush.msra.mxu3 %v1062_v11  ;;  %v1883_v20 = vunpack.i.h.bf16 %v1881_v10  ;;  %v1882_v23 = vunpack.i.l.bf16 %v1881_v10 }
 0x242   : > { %v1878_v16 = vunpack.i.h.bf16 %v1876_v14  ;;  %v1877_v17 = vunpack.i.l.bf16 %v1876_v14 }
 0x243   : > { %v1060_v29 = vsel %vm1056_vm9, %v1883_v20, %v1892_v25 }
 0x244   : > { %v1061_v21 = vsel %vm1056_vm9, %v1877_v17, %v1878_v16 }
 0x245   : > { %1089 = vmatpush.msra.mxu3 %v1061_v21 }
 0x247   : > { %1090 = vmatpush.msra.mxu3 %v1882_v23 }
 0x248   : > { %v1886_v28 = vpop.permute.xlu1 %1885 }
 0x249   : > { %v1896_v32 = vpop.permute.xlu0 %1895  ;;  %1091 = vmatpush.msra.mxu3 %v1060_v29  ;;  %v1887_v33 = vunpack.i.l.bf16 %v1886_v28  ;;  %v1888_v37 = vunpack.i.h.bf16 %v1886_v28 }
 0x24a   : > { %v1898_v34 = vunpack.i.h.bf16 %v1896_v32  ;;  %v1897_v58 = vunpack.i.l.bf16 %v1896_v32 }
 0x24b   : > { %v1057_v42 = vsel %vm1056_vm9, %v1888_v37, %v1025_v41 }
 0x24c   : > { %v1059_v38 = vsel %vm1056_vm9, %v1893_v31, %v1897_v58  ;;  %v1058_v39 = vsel %vm1056_vm9, %v1898_v34, %v1887_v33  ;;  %vm1166_vm9 = vmand %vm1132_vm6, %vm1150_vm7  ;;  %vm1145_vm7 = vcmp.lt.s32.totalorder %v1108_v48, %v2375_v12 }
 0x24d   : > { %1092 = vmatpush.msra.mxu3 %v1059_v38  ;;  %1695 = vmatpush.msk.msra.mxu0 %vm1166_vm9, %v1943_v22  ;;  %vm1162_vm6 = vmand %vm1128_vm3, %vm1146_vm5 }
 0x24e   : > { %vm1160_vm9 = vmand %vm1126_vm10, %vm1144_vm11 }
 0x24f   : > { %1093 = vmatpush.msra.mxu3 %v1058_v39  ;;  %1696 = vmatpush.msk.msra.mxu0 %vm1165_vm14, %v1943_v22 }
 0x250   : > { %v1021_v46 = vpop.permute.xlu1 %1020 }
 0x251   : > { %v1019_v44 = vpop.permute.xlu0 %1018  ;;  %1094 = vmatpush.msra.mxu3 %v1057_v42  ;;  %1697 = vmatpush.msk.msra.mxu0 %vm1164_vm1, %v1943_v22 }
 0x252   : > { %1684 = vmatmul.msk.f32.vlgmr.msra.gmra.mxu3 %vm1074_vm4, %v1019_v44 }
 0x253   : > { %1698 = vmatpush.msk.msra.mxu0 %vm1163_vm2, %v1943_v22 }
 0x255   : > { %1699 = vmatpush.msk.msra.mxu0 %vm1162_vm6, %v1943_v22 }
 0x258   : > { %v1224_v62 = vpop.permute.xlu1 %1223 }
 0x259   : > { %v1016_v53 = vpop.permute.xlu0 %1015 }
 0x25a   : > { %1685 = vmatmul.msk.f32.gmra.mxu3 %vm1074_vm4, %v1021_v46  ;;  %vm1127_vm4 = vcmp.ge.s32.totalorder %v1108_v48, %v2369_v5 }
 0x25b   : > { %vm1161_vm8 = vmand %vm1127_vm4, %vm1145_vm7 }
 0x25c   : > { %1700 = vmatpush.msk.msra.mxu0 %vm1161_vm8, %v1943_v22 }
 0x25e   : > { %1701 = vmatpush.msk.msra.mxu0 %vm1160_vm9, %v1943_v22 }
 0x261   : > { %v1266_v11 = vpop.permute.xlu0 %1265 }
 0x269   : > { %v1263_v14 = vpop.permute.xlu0 %1262 }
 0x29f   : > { %v1221_v4 = vpop.permute.xlu1 %1220 }
 0x2a7   : > { %v1268_v12 = vpop.permute.xlu1 %1267 }
 0x2d5   : > { %v1096_v27 = vpop.f32.mrf.mxu3 }
 0x2d6   : > { %v1097_v51 = vadd.f32 %v1096_v27, %v1011_v49 }
 0x2d8   : > { %v1102_v63 = vmax.f32 %v1097_v51, 0.0 }
 0x2da   : > { %v1104_v52 = vmul.f32 %v2337_v7, %v1102_v63 }
 0x2dc   : > { %1208 = vmatmul.f32.vlgmr.msra.gmra.mxu0 %v1104_v52 }
 0x2dd   : > { %v1099_v54 = vpop.f32.mrf.mxu3 }
 0x2de   : > { %v1100_v55 = vadd.f32 %v1099_v54, %v1016_v53 }
 0x2e0   : > { %v1103_v56 = vmax.f32 %v1100_v55, 0.0 }
 0x2e2   : > { %v1105_v57 = vmul.f32 %v2337_v7, %v1103_v56  ;;  %v1226_v7 = vpop.permute.xlu2 %1225 }
 0x2e4   : > { %1211 = vmatmul.f32.gmra.mxu0 %v1105_v57 }
 0x2ea   : > { %v1217_v3 = vpop.permute.xlu2 %1216 }
 0x2f2   : > { %v1259_v50 = vpop.permute.xlu2 %1258 }
 0x359   : > { %v1209_v60 = vpop.f32.mrf.mxu0 }
 0x361   : > { %v1212_v61 = vpop.f32.mrf.mxu0 }
 0x362   : > { %1246 = vmatpush.msrb.mxu1 %v1212_v61 }
 0x364   : > { %1247 = vmatpush.msrb.mxu1 %v1209_v60 }
 0x365   : > { %1702 = vmatmul.msk.f32.vlgmr.msrb.gmra.mxu1 %vm1227_vm12, %v1224_v62 }
 0x36d   : > { %1703 = vmatmul.msk.f32.gmra.mxu1 %vm1227_vm12, %v1226_v7 }
 0x3e2   : > { %v1249_v2 = vpop.f32.mrf.mxu1 }
 0x3e3   : > { %v1250_v6 = vadd.f32 %v1249_v2, %v1217_v3 }
 0x3e5   : > { %v1255_v10 = vmax.f32 %v1250_v6, 0.0 }
 0x3ea   : > { %v1252_v5 = vpop.f32.mrf.mxu1 }
 0x3eb   : > { %v1253_v8 = vadd.f32 %v1252_v5, %v1221_v4 }
 0x3ed   : > { %v1256_v9 = vmax.f32 %v1253_v8, 0.0 }
 0x3ef   : > { %1287 = vmatpush.msrb.mxu3 %v1256_v9 }
 0x3f1   : > { %1288 = vmatpush.msrb.mxu3 %v1255_v10 }
 0x3f2   : > { %1704 = vmatmul.msk.f32.vlgmr.msrb.gmra.mxu3 %vm1227_vm12, %v1266_v11 }
 0x3fa   : > { %1705 = vmatmul.msk.f32.gmra.mxu3 %vm1227_vm12, %v1268_v12 }
 0x475   : > { %v1290_v0 = vpop.f32.mrf.mxu3 }
 0x476   : > { %v1291_v13 = vadd.f32 %v1290_v0, %v1259_v50 }
 0x478   : > { %1296 = vst [vmem:[%s345_s13] sm:$0xff] %v1291_v13 }
 0x47c   : > { %1304 = sbr.rel (!%p2003_p5) target bundleno = 1161 (0x489), region = 63 }
 0x47d   : > { %v1293_v15 = vpop.f32.mrf.mxu3 }
 0x47e   : > { %v1294_v16 = vadd.f32 %v1293_v15, %v1263_v14 }
 0x47f   : > { %v1337_v17 = vld [vmem:[%s345_s13] sm:$0xff] (%p2003_p5) }
 0x480   : > { %1297 = vst [vmem:[%s345_s13 + $0x8] sm:$0xff] %v1294_v16 }
 0x481   : > { %1338 = vst [vmem:[%s1306_s5] sm:$0xff] %v1337_v17 }
 0x487   : > { %v1339_v18 = vld [vmem:[%s345_s13 + $0x8] sm:$0xff] }
 0x488   : > { %1340 = vst [vmem:[%s1306_s5 + $0x10] sm:$0xff] %v1339_v18 }
 0x489 PF: > { %p11_p10 = scmp.ge.s32.totalorder %s1990_s19, 4   ;;  %s2498_s15 = smov %s1924_s16 }
 0x48a   : > { %s2499_s16 = smov %s2001_s22  ;;  %s2500_s17 = smov %s1990_s19 }
 0x48b   :  { %13 = sbr.rel (!%p11_p10) target bundleno = 2 (0x2), region = 132 }

</bundles_post_ra>
